<compile_context>
chip_gen: v6e
topology: v6e:2x2x1
jax: 0.10.0
libtpu: 0.0.40
codegen_flags: <defaults>
</compile_context>

<pallas_src>
import functools

import jax
import jax.numpy as jnp
from jax.experimental import pallas as pl
from jax.experimental.pallas import tpu as pltpu

F32 = jnp.float32


# --------------------------------------------------------------------------
# In-kernel helpers
# --------------------------------------------------------------------------
def _gelu_exact(x):
    # erf-based GELU matching nn.GELU(); erf via Abramowitz-Stegun 7.1.26
    # polynomial so only exp / reciprocal (EUP) + mul/add (VPU) are used.
    z = x * 0.7071067811865476
    az = jnp.abs(z)
    t = pl.reciprocal(1.0 + 0.3275911 * az, approx=True)   # EUP, not VALU
    poly = t * (0.254829592 + t * (-0.284496736 + t * (1.421413741
                + t * (-1.453152027 + t * 1.061405429))))
    erf_abs = 1.0 - poly * jnp.exp(-az * az)
    erf = jnp.where(z >= 0.0, erf_abs, -erf_abs)
    return 0.5 * x * (1.0 + erf)


# --------------------------------------------------------------------------
# Fused Mlp kernel (one batch element per grid step)
# --------------------------------------------------------------------------
def _mlp_kernel(x_ref, w1_ref, b1_ref, wd_ref, bd_ref, w2_ref, b2_ref, o_ref,
                *, H, W):
    """Fused fc1 -> dwconv3x3 -> GELU -> fc2 for one batch element.

    Layout: channels on sublanes, flattened spatial (H*W) on lanes.

    x_ref  : (1, Cin, H*W)   matmul dtype (bf16 by default)
    w1_ref : (Hd, Cin)       fc1 weight   (matmul dtype)
    b1_ref : (Hd, 1)         fc1 bias     (f32)
    wd_ref : (Hd, 9)         depthwise 3x3 taps, tap index = kh*3 + kw (f32)
    bd_ref : (Hd, 1)         depthwise bias (f32)
    w2_ref : (Cout, Hd)      fc2 weight   (matmul dtype)
    b2_ref : (Cout, 1)       fc2 bias     (f32)
    o_ref  : (1, Cout, H*W)  f32 output (lane-dense store)
    """
    HW = H * W

    # ---- fc1 (1x1 conv): (Hd, Cin) @ (Cin, HW) on the MXU, f32 accumulate --
    h = jnp.dot(w1_ref[...], x_ref[0],
                preferred_element_type=jnp.float32) + b1_ref[...]   # (Hd, HW)

    # ---- depthwise 3x3, stride 1, pad 1, in the flat layout -----------------
    # Neighbour pixels are lane rotations of the flat hidden map; the image
    # border zero-padding is realised with row/column boundary masks.
    lane = jax.lax.broadcasted_iota(jnp.int32, (1, HW), 1)
    col = lane % W
    ok = {
        (-1, 0): lane >= W,              # a row above exists
        (1, 0): lane < (H - 1) * W,      # a row below exists
        (0, -1): col >= 1,               # a column to the left exists
        (0, 1): col <= W - 2,            # a column to the right exists
    }

    wd = wd_ref[...]                     # (Hd, 9)
    acc = h * wd[:, 4:5]                 # centre tap (kh=1, kw=1), no shift
    for kh in range(3):
        for kw in range(3):
            dh, dw = kh - 1, kw - 1
            if dh == 0 and dw == 0:
                continue
            off = dh * W + dw                       # flat offset of neighbour
            shift = (-off) % HW                     # nb[p] = h[p + off]
            nb = pltpu.roll(h, shift=shift, axis=1)     # XLU lane rotation
            mask = None
            if dh != 0:
                mask = ok[(dh, 0)]
            if dw != 0:
                m2 = ok[(0, dw)]
                mask = m2 if mask is None else jnp.logical_and(mask, m2)
            nb = jnp.where(mask, nb, 0.0)
            acc = acc + nb * wd[:, kh * 3 + kw:kh * 3 + kw + 1]
    acc = acc + bd_ref[...]

    # ---- GELU (erf-based) ---------------------------------------------------
    acc = _gelu_exact(acc)

    # ---- fc2 (1x1 conv): (Cout, Hd) @ (Hd, HW); spatial stays on lanes ------
    y = jnp.dot(w2_ref[...], acc.astype(w2_ref.dtype),
                preferred_element_type=jnp.float32) + b2_ref[...]   # (Cout, HW)
    o_ref[0] = y.astype(o_ref.dtype)


# --------------------------------------------------------------------------
# Public wrapper (NCHW in / NCHW out, like the PyTorch module)
# --------------------------------------------------------------------------
def mlp_forward(params, x_nchw, *, matmul_dtype=jnp.bfloat16):
    B, Cin, H, W = x_nchw.shape
    HW = H * W

    # Weights in PyTorch Conv2d orientation: (out, in) / (out, kh, kw).
    w1 = params["fc1_w"].astype(matmul_dtype)                 # (Hd, Cin)
    b1 = params["fc1_b"].reshape(-1, 1).astype(F32)           # (Hd, 1)
    wd = params["dw_w"].reshape(-1, 9).astype(F32)            # (Hd, 9)
    bd = params["dw_b"].reshape(-1, 1).astype(F32)            # (Hd, 1)
    w2 = params["fc2_w"].astype(matmul_dtype)                 # (Cout, Hd)
    b2 = params["fc2_b"].reshape(-1, 1).astype(F32)           # (Cout, 1)
    Hd = w1.shape[0]
    Cout = w2.shape[0]

    # NCHW kept as-is: only a free reshape + bf16 cast, no transpose passes.
    x = x_nchw.reshape(B, Cin, HW).astype(matmul_dtype)

    # Explicit scoped-VMEM limit: estimated working set + headroom, clamped
    # so it stays within every generation's physical VMEM (64 MiB on v7x).
    mm_bytes = jnp.dtype(matmul_dtype).itemsize
    est = (2 * HW * Cin * mm_bytes                 # double-buffered input block
           + 2 * HW * Cout * 4                     # double-buffered output block
           + 2 * (Hd * Cin + Cout * Hd) * mm_bytes # fc1/fc2 weights
           + 2 * (Hd * 9 + 2 * Hd + Cout) * 4      # dw taps + biases
           + 6 * HW * Hd * 4                       # hidden map + roll/select temps
           + (4 << 20))
    vmem_limit = int(min(max(est, 32 << 20), 64 << 20))

    def _const(shape):
        n = len(shape)
        return pl.BlockSpec(shape, lambda b, _n=n: (0,) * _n)

    out = pl.pallas_call(
        functools.partial(_mlp_kernel, H=H, W=W),
        grid=(B,),
        in_specs=[
            pl.BlockSpec((1, Cin, HW), lambda b: (b, 0, 0)),
            _const((Hd, Cin)), _const((Hd, 1)),            # fc1
            _const((Hd, 9)), _const((Hd, 1)),              # dwconv
            _const((Cout, Hd)), _const((Cout, 1)),         # fc2
        ],
        out_specs=pl.BlockSpec((1, Cout, HW), lambda b: (b, 0, 0)),
        out_shape=jax.ShapeDtypeStruct((B, Cout, HW), F32),
        compiler_params=pltpu.CompilerParams(
            dimension_semantics=("parallel",),
            vmem_limit_bytes=vmem_limit),
    )(x, w1, b1, wd, bd, w2, b2)

    return out.reshape(B, Cout, H, W)


# --------------------------------------------------------------------------
# Parameters (deterministic synthetic init) and pure-JAX reference
# --------------------------------------------------------------------------
def init_params(key, dim, hidden, out_dim=None):
    out_dim = out_dim or dim
    ks = iter(jax.random.split(key, 6))

    def nrm(shape, std=0.02):
        return std * jax.random.normal(next(ks), shape, dtype=F32)

    return dict(
        fc1_w=nrm((hidden, dim)), fc1_b=nrm((hidden,)),
        dw_w=nrm((hidden, 3, 3)), dw_b=nrm((hidden,)),
        fc2_w=nrm((out_dim, hidden)), fc2_b=nrm((out_dim,)),
    )


def mlp_reference(params, x_nchw):
    # Plain-JAX reference (same math, XLA ops) used only for verification.
    x = x_nchw.astype(F32)
    h = jnp.einsum("bchw,dc->bdhw", x, params["fc1_w"]) \
        + params["fc1_b"][None, :, None, None]
    B, Hd, H, W = h.shape
    hp = jnp.pad(h, ((0, 0), (0, 0), (1, 1), (1, 1)))
    acc = jnp.zeros_like(h)
    for kh in range(3):
        for kw in range(3):
            acc = acc + hp[:, :, kh:kh + H, kw:kw + W] \
                * params["dw_w"][None, :, kh, kw, None, None]
    acc = acc + params["dw_b"][None, :, None, None]
    acc = jax.nn.gelu(acc, approximate=False)
    y = jnp.einsum("bdhw,cd->bchw", acc, params["fc2_w"]) \
        + params["fc2_b"][None, :, None, None]
    return y


if __name__ == "__main__":
    B, Cin, H, W = 2, 4, 16, 16
    hidden = 32                     # hidden_features of the Mlp
    key = jax.random.PRNGKey(0)
    k_par, k_x = jax.random.split(key)
    params = init_params(k_par, Cin, hidden)
    x = jax.random.normal(k_x, (B, Cin, H, W), dtype=F32)   # PyTorch-style NCHW

    # Default (performance) path: bf16 MXU operands, f32 accumulation.
    fwd = jax.jit(mlp_forward)
    out = jax.block_until_ready(fwd(params, x))
    assert out.shape == (B, Cin, H, W)
    assert bool(jnp.all(jnp.isfinite(out)))

    ref = mlp_reference(params, x)
    # bf16 operands change numerics vs the f32 reference -> loosened tolerance.
    assert bool(jnp.allclose(out, ref, atol=2e-3, rtol=2e-2)), "bf16 path mismatch"

    # Fidelity path: f32 MXU operands, tight tolerance against the reference.
    fwd32 = jax.jit(functools.partial(mlp_forward, matmul_dtype=jnp.float32))
    out32 = jax.block_until_ready(fwd32(params, x))
    assert bool(jnp.allclose(out32, ref, atol=1e-4, rtol=1e-4)), "f32 path mismatch"

    print("KERNEL_OK")
</pallas_src>

<mosaic_0001>
module attributes {stable_mosaic.version = 11 : i64} {
  func.func @_mlp_kernel(%arg0: i32, %arg1: memref<1x4x256xbf16, #tpu.memory_space<vmem>>, %arg2: memref<32x4xbf16, #tpu.memory_space<vmem>>, %arg3: memref<32x1xf32, #tpu.memory_space<vmem>>, %arg4: memref<32x9xf32, #tpu.memory_space<vmem>>, %arg5: memref<32x1xf32, #tpu.memory_space<vmem>>, %arg6: memref<4x32xbf16, #tpu.memory_space<vmem>>, %arg7: memref<4x1xf32, #tpu.memory_space<vmem>>, %arg8: memref<1x4x256xf32, #tpu.memory_space<vmem>>) attributes {dimension_semantics = [#tpu.dimension_semantics<parallel>], iteration_bounds = array<i64: 2>, scalar_prefetch = 0 : i64, scratch_operands = 0 : i64, tpu.core_type = #tpu.core_type<tc>, window_params = [{transform_indices = @transform_0, window_bounds = array<i64: 1, 4, 256>}, {pipeline_mode = #tpu.pipeline_mode<synchronous>, transform_indices = @transform_1, window_bounds = array<i64: 32, 4>}, {pipeline_mode = #tpu.pipeline_mode<synchronous>, transform_indices = @transform_2, window_bounds = array<i64: 32, 1>}, {pipeline_mode = #tpu.pipeline_mode<synchronous>, transform_indices = @transform_3, window_bounds = array<i64: 32, 9>}, {pipeline_mode = #tpu.pipeline_mode<synchronous>, transform_indices = @transform_4, window_bounds = array<i64: 32, 1>}, {pipeline_mode = #tpu.pipeline_mode<synchronous>, transform_indices = @transform_5, window_bounds = array<i64: 4, 32>}, {pipeline_mode = #tpu.pipeline_mode<synchronous>, transform_indices = @transform_6, window_bounds = array<i64: 4, 1>}, {transform_indices = @transform_7, window_bounds = array<i64: 1, 4, 256>}]} {
    %c0 = arith.constant 0 : index
    %c0_0 = arith.constant 0 : index
    %0 = vector.load %arg2[%c0, %c0_0] : memref<32x4xbf16, #tpu.memory_space<vmem>>, vector<32x4xbf16>
    %c0_1 = arith.constant 0 : index
    %c0_2 = arith.constant 0 : index
    %c0_3 = arith.constant 0 : index
    %1 = vector.load %arg1[%c0_1, %c0_2, %c0_3] : memref<1x4x256xbf16, #tpu.memory_space<vmem>>, vector<1x4x256xbf16>
    %2 = vector.shape_cast %1 : vector<1x4x256xbf16> to vector<4x256xbf16>
    %cst = arith.constant dense<0.000000e+00> : vector<32x256xf32>
    %3 = tpu.matmul %0, %2, %cst {dimension_numbers = #tpu.dot_dimension_numbers<[1], [0], [0], [1], [0, 0, 1, 1], [], []>} : vector<32x4xbf16>, vector<4x256xbf16>, vector<32x256xf32> -> vector<32x256xf32>
    %c0_4 = arith.constant 0 : index
    %c0_5 = arith.constant 0 : index
    %4 = vector.load %arg3[%c0_4, %c0_5] : memref<32x1xf32, #tpu.memory_space<vmem>>, vector<32x1xf32>
    %5 = vector.broadcast %4 : vector<32x1xf32> to vector<32x256xf32>
    %6 = arith.addf %3, %5 : vector<32x256xf32>
    %7 = tpu.iota {dimensions = array<i32: 1>} : vector<1x256xi32>
    %c16_i32 = arith.constant 16 : i32
    %c0_i32 = arith.constant 0 : i32
    %8 = arith.cmpi eq, %c16_i32, %c0_i32 : i32
    %c1_i32 = arith.constant 1 : i32
    %9 = arith.select %8, %c1_i32, %c16_i32 : i32
    %10 = vector.broadcast %9 : i32 to vector<1x256xi32>
    %11 = arith.remsi %7, %10 : vector<1x256xi32>
    %c0_i32_6 = arith.constant 0 : i32
    %12 = vector.broadcast %c0_i32_6 : i32 to vector<1x256xi32>
    %13 = arith.cmpi ne, %11, %12 : vector<1x256xi32>
    %c0_i32_7 = arith.constant 0 : i32
    %14 = vector.broadcast %c0_i32_7 : i32 to vector<1x256xi32>
    %15 = arith.cmpi slt, %11, %14 : vector<1x256xi32>
    %c0_i32_8 = arith.constant 0 : i32
    %16 = arith.cmpi slt, %9, %c0_i32_8 : i32
    %17 = vector.broadcast %16 : i1 to vector<1x256xi1>
    %18 = vector.broadcast %17 : vector<1x256xi1> to vector<1x256xi1>
    %19 = arith.xori %15, %18 : vector<1x256xi1>
    %20 = arith.andi %19, %13 : vector<1x256xi1>
    %21 = vector.broadcast %9 : i32 to vector<1x256xi32>
    %22 = arith.addi %11, %21 : vector<1x256xi32>
    %23 = arith.select %20, %22, %11 : vector<1x256xi1>, vector<1x256xi32>
    %c16_i32_9 = arith.constant 16 : i32
    %24 = vector.broadcast %c16_i32_9 : i32 to vector<1x256xi32>
    %25 = arith.cmpi sge, %7, %24 : vector<1x256xi32>
    %c240_i32 = arith.constant 240 : i32
    %26 = vector.broadcast %c240_i32 : i32 to vector<1x256xi32>
    %27 = arith.cmpi slt, %7, %26 : vector<1x256xi32>
    %c1_i32_10 = arith.constant 1 : i32
    %28 = vector.broadcast %c1_i32_10 : i32 to vector<1x256xi32>
    %29 = arith.cmpi sge, %23, %28 : vector<1x256xi32>
    %c14_i32 = arith.constant 14 : i32
    %30 = vector.broadcast %c14_i32 : i32 to vector<1x256xi32>
    %31 = arith.cmpi sle, %23, %30 : vector<1x256xi32>
    %c0_11 = arith.constant 0 : index
    %c0_12 = arith.constant 0 : index
    %32 = vector.load %arg4[%c0_11, %c0_12] : memref<32x9xf32, #tpu.memory_space<vmem>>, vector<32x9xf32>
    %33 = vector.extract_strided_slice %32 {offsets = [0, 4], sizes = [32, 1], strides = [1, 1]} : vector<32x9xf32> to vector<32x1xf32>
    %34 = vector.broadcast %33 : vector<32x1xf32> to vector<32x256xf32>
    %35 = arith.mulf %6, %34 : vector<32x256xf32>
    %c17_i32 = arith.constant 17 : i32
    %36 = tpu.dynamic_rotate %6 by %c17_i32 dim 1 : vector<32x256xf32>, i32 -> vector<32x256xf32>
    %37 = arith.andi %25, %29 : vector<1x256xi1>
    %cst_13 = arith.constant 0.000000e+00 : f32
    %38 = vector.shape_cast %37 : vector<1x256xi1> to vector<1x256xi1>
    %39 = vector.broadcast %38 : vector<1x256xi1> to vector<32x256xi1>
    %40 = vector.broadcast %cst_13 : f32 to vector<32x256xf32>
    %41 = arith.select %39, %36, %40 : vector<32x256xi1>, vector<32x256xf32>
    %42 = vector.extract_strided_slice %32 {offsets = [0, 0], sizes = [32, 1], strides = [1, 1]} : vector<32x9xf32> to vector<32x1xf32>
    %43 = vector.broadcast %42 : vector<32x1xf32> to vector<32x256xf32>
    %44 = arith.mulf %41, %43 : vector<32x256xf32>
    %45 = arith.addf %35, %44 : vector<32x256xf32>
    %c16_i32_14 = arith.constant 16 : i32
    %46 = tpu.dynamic_rotate %6 by %c16_i32_14 dim 1 : vector<32x256xf32>, i32 -> vector<32x256xf32>
    %cst_15 = arith.constant 0.000000e+00 : f32
    %47 = vector.shape_cast %25 : vector<1x256xi1> to vector<1x256xi1>
    %48 = vector.broadcast %47 : vector<1x256xi1> to vector<32x256xi1>
    %49 = vector.broadcast %cst_15 : f32 to vector<32x256xf32>
    %50 = arith.select %48, %46, %49 : vector<32x256xi1>, vector<32x256xf32>
    %51 = vector.extract_strided_slice %32 {offsets = [0, 1], sizes = [32, 1], strides = [1, 1]} : vector<32x9xf32> to vector<32x1xf32>
    %52 = vector.broadcast %51 : vector<32x1xf32> to vector<32x256xf32>
    %53 = arith.mulf %50, %52 : vector<32x256xf32>
    %54 = arith.addf %45, %53 : vector<32x256xf32>
    %c15_i32 = arith.constant 15 : i32
    %55 = tpu.dynamic_rotate %6 by %c15_i32 dim 1 : vector<32x256xf32>, i32 -> vector<32x256xf32>
    %56 = arith.andi %25, %31 : vector<1x256xi1>
    %cst_16 = arith.constant 0.000000e+00 : f32
    %57 = vector.shape_cast %56 : vector<1x256xi1> to vector<1x256xi1>
    %58 = vector.broadcast %57 : vector<1x256xi1> to vector<32x256xi1>
    %59 = vector.broadcast %cst_16 : f32 to vector<32x256xf32>
    %60 = arith.select %58, %55, %59 : vector<32x256xi1>, vector<32x256xf32>
    %61 = vector.extract_strided_slice %32 {offsets = [0, 2], sizes = [32, 1], strides = [1, 1]} : vector<32x9xf32> to vector<32x1xf32>
    %62 = vector.broadcast %61 : vector<32x1xf32> to vector<32x256xf32>
    %63 = arith.mulf %60, %62 : vector<32x256xf32>
    %64 = arith.addf %54, %63 : vector<32x256xf32>
    %c1_i32_17 = arith.constant 1 : i32
    %65 = tpu.dynamic_rotate %6 by %c1_i32_17 dim 1 : vector<32x256xf32>, i32 -> vector<32x256xf32>
    %cst_18 = arith.constant 0.000000e+00 : f32
    %66 = vector.shape_cast %29 : vector<1x256xi1> to vector<1x256xi1>
    %67 = vector.broadcast %66 : vector<1x256xi1> to vector<32x256xi1>
    %68 = vector.broadcast %cst_18 : f32 to vector<32x256xf32>
    %69 = arith.select %67, %65, %68 : vector<32x256xi1>, vector<32x256xf32>
    %70 = vector.extract_strided_slice %32 {offsets = [0, 3], sizes = [32, 1], strides = [1, 1]} : vector<32x9xf32> to vector<32x1xf32>
    %71 = vector.broadcast %70 : vector<32x1xf32> to vector<32x256xf32>
    %72 = arith.mulf %69, %71 : vector<32x256xf32>
    %73 = arith.addf %64, %72 : vector<32x256xf32>
    %c255_i32 = arith.constant 255 : i32
    %74 = tpu.dynamic_rotate %6 by %c255_i32 dim 1 : vector<32x256xf32>, i32 -> vector<32x256xf32>
    %cst_19 = arith.constant 0.000000e+00 : f32
    %75 = vector.shape_cast %31 : vector<1x256xi1> to vector<1x256xi1>
    %76 = vector.broadcast %75 : vector<1x256xi1> to vector<32x256xi1>
    %77 = vector.broadcast %cst_19 : f32 to vector<32x256xf32>
    %78 = arith.select %76, %74, %77 : vector<32x256xi1>, vector<32x256xf32>
    %79 = vector.extract_strided_slice %32 {offsets = [0, 5], sizes = [32, 1], strides = [1, 1]} : vector<32x9xf32> to vector<32x1xf32>
    %80 = vector.broadcast %79 : vector<32x1xf32> to vector<32x256xf32>
    %81 = arith.mulf %78, %80 : vector<32x256xf32>
    %82 = arith.addf %73, %81 : vector<32x256xf32>
    %c241_i32 = arith.constant 241 : i32
    %83 = tpu.dynamic_rotate %6 by %c241_i32 dim 1 : vector<32x256xf32>, i32 -> vector<32x256xf32>
    %84 = arith.andi %27, %29 : vector<1x256xi1>
    %cst_20 = arith.constant 0.000000e+00 : f32
    %85 = vector.shape_cast %84 : vector<1x256xi1> to vector<1x256xi1>
    %86 = vector.broadcast %85 : vector<1x256xi1> to vector<32x256xi1>
    %87 = vector.broadcast %cst_20 : f32 to vector<32x256xf32>
    %88 = arith.select %86, %83, %87 : vector<32x256xi1>, vector<32x256xf32>
    %89 = vector.extract_strided_slice %32 {offsets = [0, 6], sizes = [32, 1], strides = [1, 1]} : vector<32x9xf32> to vector<32x1xf32>
    %90 = vector.broadcast %89 : vector<32x1xf32> to vector<32x256xf32>
    %91 = arith.mulf %88, %90 : vector<32x256xf32>
    %92 = arith.addf %82, %91 : vector<32x256xf32>
    %c240_i32_21 = arith.constant 240 : i32
    %93 = tpu.dynamic_rotate %6 by %c240_i32_21 dim 1 : vector<32x256xf32>, i32 -> vector<32x256xf32>
    %cst_22 = arith.constant 0.000000e+00 : f32
    %94 = vector.shape_cast %27 : vector<1x256xi1> to vector<1x256xi1>
    %95 = vector.broadcast %94 : vector<1x256xi1> to vector<32x256xi1>
    %96 = vector.broadcast %cst_22 : f32 to vector<32x256xf32>
    %97 = arith.select %95, %93, %96 : vector<32x256xi1>, vector<32x256xf32>
    %98 = vector.extract_strided_slice %32 {offsets = [0, 7], sizes = [32, 1], strides = [1, 1]} : vector<32x9xf32> to vector<32x1xf32>
    %99 = vector.broadcast %98 : vector<32x1xf32> to vector<32x256xf32>
    %100 = arith.mulf %97, %99 : vector<32x256xf32>
    %101 = arith.addf %92, %100 : vector<32x256xf32>
    %c239_i32 = arith.constant 239 : i32
    %102 = tpu.dynamic_rotate %6 by %c239_i32 dim 1 : vector<32x256xf32>, i32 -> vector<32x256xf32>
    %103 = arith.andi %27, %31 : vector<1x256xi1>
    %cst_23 = arith.constant 0.000000e+00 : f32
    %104 = vector.shape_cast %103 : vector<1x256xi1> to vector<1x256xi1>
    %105 = vector.broadcast %104 : vector<1x256xi1> to vector<32x256xi1>
    %106 = vector.broadcast %cst_23 : f32 to vector<32x256xf32>
    %107 = arith.select %105, %102, %106 : vector<32x256xi1>, vector<32x256xf32>
    %108 = vector.extract_strided_slice %32 {offsets = [0, 8], sizes = [32, 1], strides = [1, 1]} : vector<32x9xf32> to vector<32x1xf32>
    %109 = vector.broadcast %108 : vector<32x1xf32> to vector<32x256xf32>
    %110 = arith.mulf %107, %109 : vector<32x256xf32>
    %111 = arith.addf %101, %110 : vector<32x256xf32>
    %c0_24 = arith.constant 0 : index
    %c0_25 = arith.constant 0 : index
    %112 = vector.load %arg5[%c0_24, %c0_25] : memref<32x1xf32, #tpu.memory_space<vmem>>, vector<32x1xf32>
    %113 = vector.broadcast %112 : vector<32x1xf32> to vector<32x256xf32>
    %114 = arith.addf %111, %113 : vector<32x256xf32>
    %cst_26 = arith.constant 0.707106769 : f32
    %115 = vector.broadcast %cst_26 : f32 to vector<32x256xf32>
    %116 = arith.mulf %114, %115 : vector<32x256xf32>
    %117 = math.absf %116 : vector<32x256xf32>
    %cst_27 = arith.constant 0.327591091 : f32
    %118 = vector.broadcast %cst_27 : f32 to vector<32x256xf32>
    %119 = arith.mulf %118, %117 : vector<32x256xf32>
    %cst_28 = arith.constant 1.000000e+00 : f32
    %120 = vector.broadcast %cst_28 : f32 to vector<32x256xf32>
    %121 = arith.addf %120, %119 : vector<32x256xf32>
    %122 = tpu.reciprocal %121 {approx = true} : vector<32x256xf32> -> vector<32x256xf32>
    %cst_29 = arith.constant 1.06140542 : f32
    %123 = vector.broadcast %cst_29 : f32 to vector<32x256xf32>
    %124 = arith.mulf %122, %123 : vector<32x256xf32>
    %cst_30 = arith.constant -1.45315206 : f32
    %125 = vector.broadcast %cst_30 : f32 to vector<32x256xf32>
    %126 = arith.addf %125, %124 : vector<32x256xf32>
    %127 = arith.mulf %122, %126 : vector<32x256xf32>
    %cst_31 = arith.constant 1.42141378 : f32
    %128 = vector.broadcast %cst_31 : f32 to vector<32x256xf32>
    %129 = arith.addf %128, %127 : vector<32x256xf32>
    %130 = arith.mulf %122, %129 : vector<32x256xf32>
    %cst_32 = arith.constant -0.284496725 : f32
    %131 = vector.broadcast %cst_32 : f32 to vector<32x256xf32>
    %132 = arith.addf %131, %130 : vector<32x256xf32>
    %133 = arith.mulf %122, %132 : vector<32x256xf32>
    %cst_33 = arith.constant 0.254829586 : f32
    %134 = vector.broadcast %cst_33 : f32 to vector<32x256xf32>
    %135 = arith.addf %134, %133 : vector<32x256xf32>
    %136 = arith.mulf %122, %135 : vector<32x256xf32>
    %cst_34 = arith.constant 0.000000e+00 : f32
    %137 = vector.broadcast %cst_34 : f32 to vector<32x256xf32>
    %138 = arith.subf %137, %117 : vector<32x256xf32>
    %139 = arith.mulf %138, %117 : vector<32x256xf32>
    %140 = math.exp %139 : vector<32x256xf32>
    %141 = arith.mulf %136, %140 : vector<32x256xf32>
    %cst_35 = arith.constant 1.000000e+00 : f32
    %142 = vector.broadcast %cst_35 : f32 to vector<32x256xf32>
    %143 = arith.subf %142, %141 : vector<32x256xf32>
    %cst_36 = arith.constant 0.000000e+00 : f32
    %144 = vector.broadcast %cst_36 : f32 to vector<32x256xf32>
    %145 = arith.cmpf oge, %116, %144 : vector<32x256xf32>
    %cst_37 = arith.constant 0.000000e+00 : f32
    %146 = vector.broadcast %cst_37 : f32 to vector<32x256xf32>
    %147 = arith.subf %146, %143 : vector<32x256xf32>
    %148 = arith.select %145, %143, %147 : vector<32x256xi1>, vector<32x256xf32>
    %cst_38 = arith.constant 5.000000e-01 : f32
    %149 = vector.broadcast %cst_38 : f32 to vector<32x256xf32>
    %150 = arith.mulf %149, %114 : vector<32x256xf32>
    %cst_39 = arith.constant 1.000000e+00 : f32
    %151 = vector.broadcast %cst_39 : f32 to vector<32x256xf32>
    %152 = arith.addf %151, %148 : vector<32x256xf32>
    %153 = arith.mulf %150, %152 : vector<32x256xf32>
    %c0_40 = arith.constant 0 : index
    %c0_41 = arith.constant 0 : index
    %154 = vector.load %arg6[%c0_40, %c0_41] : memref<4x32xbf16, #tpu.memory_space<vmem>>, vector<4x32xbf16>
    %155 = arith.truncf %153 : vector<32x256xf32> to vector<32x256xbf16>
    %cst_42 = arith.constant dense<0.000000e+00> : vector<4x256xf32>
    %156 = tpu.matmul %154, %155, %cst_42 {dimension_numbers = #tpu.dot_dimension_numbers<[1], [0], [0], [1], [0, 0, 1, 1], [], []>} : vector<4x32xbf16>, vector<32x256xbf16>, vector<4x256xf32> -> vector<4x256xf32>
    %c0_43 = arith.constant 0 : index
    %c0_44 = arith.constant 0 : index
    %157 = vector.load %arg7[%c0_43, %c0_44] : memref<4x1xf32, #tpu.memory_space<vmem>>, vector<4x1xf32>
    %158 = vector.broadcast %157 : vector<4x1xf32> to vector<4x256xf32>
    %159 = arith.addf %156, %158 : vector<4x256xf32>
    %c0_45 = arith.constant 0 : index
    %c0_46 = arith.constant 0 : index
    %c0_47 = arith.constant 0 : index
    %160 = vector.load %arg8[%c0_45, %c0_46, %c0_47] : memref<1x4x256xf32, #tpu.memory_space<vmem>>, vector<1x4x256xf32>
    %161 = vector.shape_cast %160 : vector<1x4x256xf32> to vector<4x256xf32>
    %162 = vector.shape_cast %159 : vector<4x256xf32> to vector<1x4x256xf32>
    tpu.vector_store %arg8[%c0_45, %c0_46, %c0_47], %162 {strides = array<i32>} : memref<1x4x256xf32, #tpu.memory_space<vmem>>, vector<1x4x256xf32>,
    return
  }
  func.func @transform_0(%arg0: i32) -> (i32, i32, i32) {
    %c0_i32 = arith.constant 0 : i32
    %c0_i32_0 = arith.constant 0 : i32
    %c0_i32_1 = arith.constant 0 : i32
    return %arg0, %c0_i32, %c0_i32_0 : i32, i32, i32
  }
  func.func @transform_1(%arg0: i32) -> (i32, i32) {
    %c0_i32 = arith.constant 0 : i32
    %c0_i32_0 = arith.constant 0 : i32
    %c0_i32_1 = arith.constant 0 : i32
    return %c0_i32, %c0_i32_0 : i32, i32
  }
  func.func @transform_2(%arg0: i32) -> (i32, i32) {
    %c0_i32 = arith.constant 0 : i32
    %c0_i32_0 = arith.constant 0 : i32
    %c0_i32_1 = arith.constant 0 : i32
    return %c0_i32, %c0_i32_0 : i32, i32
  }
  func.func @transform_3(%arg0: i32) -> (i32, i32) {
    %c0_i32 = arith.constant 0 : i32
    %c0_i32_0 = arith.constant 0 : i32
    %c0_i32_1 = arith.constant 0 : i32
    return %c0_i32, %c0_i32_0 : i32, i32
  }
  func.func @transform_4(%arg0: i32) -> (i32, i32) {
    %c0_i32 = arith.constant 0 : i32
    %c0_i32_0 = arith.constant 0 : i32
    %c0_i32_1 = arith.constant 0 : i32
    return %c0_i32, %c0_i32_0 : i32, i32
  }
  func.func @transform_5(%arg0: i32) -> (i32, i32) {
    %c0_i32 = arith.constant 0 : i32
    %c0_i32_0 = arith.constant 0 : i32
    %c0_i32_1 = arith.constant 0 : i32
    return %c0_i32, %c0_i32_0 : i32, i32
  }
  func.func @transform_6(%arg0: i32) -> (i32, i32) {
    %c0_i32 = arith.constant 0 : i32
    %c0_i32_0 = arith.constant 0 : i32
    %c0_i32_1 = arith.constant 0 : i32
    return %c0_i32, %c0_i32_0 : i32, i32
  }
  func.func @transform_7(%arg0: i32) -> (i32, i32, i32) {
    %c0_i32 = arith.constant 0 : i32
    %c0_i32_0 = arith.constant 0 : i32
    %c0_i32_1 = arith.constant 0 : i32
    return %arg0, %c0_i32, %c0_i32_0 : i32, i32, i32
  }
}

</mosaic_0001>

<bundles_post_ra>
// kernel: mlp_forward.1
= control target key start
LH: loop header
LB: loop body
LE: loop exit
PB: predicated region body
PF: predicated region fallthrough
CT: control target
= control target key end

     0   :  { %s1551_s24 = smov 0   ;;  %s2540_s0 = inlined_call_operand.vmem [shape: bf16[2,4,256], index: 0, kind: input, shape index: {}]   ;;  %s2541_s1 = inlined_call_operand.vmem [shape: bf16[32,4], index: 1, kind: input, shape index: {}]   ;;  %s2542_s2 = inlined_call_operand.vmem [shape: f32[32,1], index: 2, kind: input, shape index: {}]   ;;  %s2543_s3 = inlined_call_operand.vmem [shape: f32[32,9], index: 3, kind: input, shape index: {}]   ;;  %s2544_s4 = inlined_call_operand.vmem [shape: f32[32,1], index: 4, kind: input, shape index: {}]   ;;  %s2545_s5 = inlined_call_operand.vmem [shape: bf16[4,32], index: 5, kind: input, shape index: {}]   ;;  %s2546_s6 = inlined_call_operand.vmem [shape: f32[4,1], index: 6, kind: input, shape index: {}]   ;;  %s2547_s7 = inlined_call_operand.vmem [shape: f32[2,4,256], index: 7, kind: output, shape index: {}]  }
   0x1 LB: > { %s1378_s25 = sadd.s32 4294967295, %s1492_s24   ;;  %p1382_p0 = scmp.ge.s32.totalorder %s1492_s24, 1  ;;  %s1492_s24 = sphi %s1551_s24, %s17_s24  }
   0x2   : > { %p237_p1 = scmp.lt.s32.totalorder %s1492_s24, 3 }
   0x4   : > { %p238_p2 = pnand %p1382_p0, %p237_p1 }
   0x6   : > { %241 = sbr.rel (%p238_p2) target bundleno = 760 (0x2f8), region = 48 }
   0xb   : > { %p269_p3 = scmp.lt.s32.totalorder %s1378_s25, 1  ;;  %v1494_v0 = vmov 0   ;;  %v1566_v1 = vld [vmem:[%s2543_s3 + $0x10] sm:$0xff]  ;;  %v1495_v2 = vmov 4   ;;  %v285_v3 = vld [vmem:[%s2542_s2] sm:$0xff]  ;;  %vm335_vm0 = vcmask 1041408  }
   0xc   : > { %374 = vmatprep.mubr.bf16.mxu0 %v1494_v0  ;;  %1423 = vset.pattern.permute.xlu1 %v1494_v0  ;;  %v1580_v4 = vld [vmem:[%s2543_s3] sm:$0xff]  ;;  %v286_v5 = vld [vmem:[%s2542_s2 + $0x8] sm:$0xff]  ;;  %vm328_vm1 = vcmask 31744   ;;  %v1496_v10 = vmov 1   ;;  %v433_v11 = vld [vmem:[%s2543_s3 + $0x18] sm:$0xff]  ;;  %v1497_v13 = vmov 2  }
   0xd   : > { %s2653_s25 = smov (!%p269_p3, %s1378_s25), 1  ;;  %1309 = vmatprep.mubr.bf16.mxu1 %v1494_v0  ;;  %1424 = vset.pattern.permute.xlu0 %v1495_v2  ;;  %v1452_v9 = vld [vmem:[%s2541_s1] sm:$0xff]   ;;  %v1453_v12 = vld [vmem:[%s2541_s1 + $0x8] sm:$0xff]   ;;  %v1498_v14 = vmov 3   ;;  %v1499_v15 = vmov 5   ;;  %v1500_v17 = vmov 6  }
   0xe   : > { %s1396_s30 = sshll.u32 %s2653_s25, 2  ;;  %446 = vperm.xlu0 %1424, %v1566_v1   ;;  %291 = vperm.xlu1 %1423, %v285_v3   ;;  %v1605_v16 = vld [vmem:[%s2543_s3 + $0x8] sm:$0xff]  ;;  %v1501_v18 = vmov 7   ;;  %v1502_v19 = vmov 8   ;;  %v287_v20 = vld [vmem:[%s2542_s2 + $0x10] sm:$0xff]  ;;  %v288_v21 = vld [vmem:[%s2542_s2 + $0x18] sm:$0xff] }
   0xf   : > { %s273_s10 = scalar_lea.vmem %s2540_s0, %s1396_s30  ;;  %s1503_s29 = smov 16  }
  0x10   : > { %v1389_v6 = vld.sshfl [vmem:[%s273_s10] sm:$0x33 pattern:$0x76325410]  ;;  %s1504_s30 = smov 17   ;;  %s1505_s8 = smov 15  }
  0x11   : > { %v327_v7 = vcombine.high %v1389_v6, %v1389_v6  ;;  %v337_v8 = vsel %vm335_vm0, %v1389_v6, 0  ;;  %s1506_s9 = smov 1   ;;  %s1507_s10 = smov 127  }
  0x12   : > { %436 = vperm.xlu0 %1424, %v1580_v4   ;;  %296 = vperm.xlu1 %1423, %v286_v5   ;;  %s1508_s11 = smov 113   ;;  %s1509_s12 = smov 112  }
  0x13   : > { %1390 = vmatprep.subr.msk.bf16.mxu0 %vm335_vm0, %v327_v7  ;;  %s1510_s13 = smov 111   ;;  %s1397_s28 = sshll.u32 %s2653_s25, 3 }
  0x14   : > { %357 = vmatpush1.bf16.msra.mxu0 %v337_v8 }
  0x16   : > { %1431 = vset.pattern.permute.xlu0 %v1496_v10  ;;  %1425 = vset.pattern.permute.xlu1 %v1495_v2 }
  0x17   : > { %1391 = vmatmul.mubr.msk.bf16.vlgmr.msra.gmra.mxu0 %vm328_vm1, %v1452_v9  ;;  %571 = vperm.xlu0 %1431, %v1580_v4  }
  0x18   : > { %384 = vmatprep.mubr.bf16.mxu0 %v1494_v0  ;;  %451 = vperm.xlu1 %1425, %v433_v11  }
  0x1b   : > { %1434 = vset.pattern.permute.xlu0 %v1497_v13 }
  0x1c   : > { %642 = vperm.xlu0 %1434, %v1580_v4   ;;  %1426 = vset.pattern.permute.xlu1 %v1494_v0 }
  0x1d   : > { %510 = vperm.xlu1 %1426, %v1566_v1  }
  0x1f   : > { %1392 = vmatmul.mubr.msk.bf16.gmra.mxu0 %vm328_vm1, %v1453_v12 }
  0x20   : > { %1435 = vset.pattern.permute.xlu0 %v1498_v14 }
  0x21   : > { %723 = vperm.xlu0 %1435, %v433_v11   ;;  %1427 = vset.pattern.permute.xlu1 %v1496_v10 }
  0x22   : > { %579 = vperm.xlu1 %1427, %v1566_v1  }
  0x25   : > { %711 = vperm.xlu0 %1435, %v1580_v4  }
  0x26   : > { %583 = vperm.xlu1 %1427, %v433_v11  }
  0x29   : > { %1438 = vset.pattern.permute.xlu0 %v1499_v15 }
  0x2a   : > { %792 = vperm.xlu0 %1438, %v433_v11   ;;  %1428 = vset.pattern.permute.xlu1 %v1495_v2 }
  0x2b   : > { %441 = vperm.xlu1 %1428, %v1605_v16  }
  0x2e   : > { %780 = vperm.xlu0 %1438, %v1580_v4  }
  0x2f   : > { %1429 = vset.pattern.permute.xlu1 %v1494_v0 }
  0x30   : > { %502 = vperm.xlu1 %1429, %v1580_v4  }
  0x32   : > { %1441 = vset.pattern.permute.xlu0 %v1500_v17 }
  0x33   : > { %863 = vperm.xlu0 %1441, %v433_v11  }
  0x34   : > { %1430 = vset.pattern.permute.xlu1 %v1497_v13 }
  0x35   : > { %650 = vperm.xlu1 %1430, %v1566_v1  }
  0x37   : > { %851 = vperm.xlu0 %1441, %v1580_v4  }
  0x39   : > { %654 = vperm.xlu1 %1430, %v433_v11  }
  0x3b   : > { %1444 = vset.pattern.permute.xlu0 %v1501_v18 }
  0x3c   : > { %932 = vperm.xlu0 %1444, %v433_v11  }
  0x3d   : > { %1432 = vset.pattern.permute.xlu1 %v1496_v10  ;;  %v395_v10 = vlaneseq }
  0x3e   : > { %575 = vperm.xlu1 %1432, %v1605_v16  }
  0x3f   : > { %v1824_v12 = vand.u32 127, %v395_v10 }
  0x40   : > { %920 = vperm.xlu0 %1444, %v1580_v4  }
  0x41   : > { %vm422_vm2 = vcmp.ge.s32.totalorder %v1824_v12, 16  ;;  %vm478_vm4 = vcmp.lt.s32.totalorder %v1824_v12, 17  ;;  %vm549_vm7 = vcmp.lt.s32.totalorder %v1824_v12, 16  ;;  %vm618_vm9 = vcmp.lt.s32.totalorder %v1824_v12, 15 }
  0x42   : > { %1433 = vset.pattern.permute.xlu1 %v1498_v14  ;;  %vm2574_vm12 = vcmp.lt.s32.totalorder %v1824_v12, 1  ;;  %vm758_vm14 = vcmp.lt.s32.totalorder %v1824_v12, 127  ;;  %vm827_vm15 = vcmp.lt.s32.totalorder %v1824_v12, 113  ;;  %vm967_vm1 = vcmp.lt.s32.totalorder %v1824_v12, 111 }
  0x43   : > { %719 = vperm.xlu1 %1433, %v1566_v1  }
  0x44   : > { %1447 = vset.pattern.permute.xlu0 %v1502_v19 }
  0x45   : > { %1003 = vperm.xlu0 %1447, %v433_v11  }
  0x47   : > { %1436 = vset.pattern.permute.xlu1 %v1497_v13 }
  0x48   : > { %646 = vperm.xlu1 %1436, %v1605_v16  }
  0x49   : > { %995 = vperm.xlu0 %1447, %v1605_v16  }
  0x4c   : > { %1437 = vset.pattern.permute.xlu1 %v1499_v15 }
  0x4d   : > { %1450 = vset.pattern.permute.xlu0 %v1494_v0  ;;  %788 = vperm.xlu1 %1437, %v1566_v1  }
  0x4e   : > { %301 = vperm.xlu0 %1450, %v287_v20  }
  0x51   : > { %1439 = vset.pattern.permute.xlu1 %v1498_v14  ;;  %v1022_v14 = vld [vmem:[%s2544_s4] sm:$0xff] }
  0x52   : > { %306 = vperm.xlu0 %1450, %v288_v21   ;;  %715 = vperm.xlu1 %1439, %v1605_v16  }
  0x56   : > { %514 = vperm.xlu0 %1450, %v433_v11   ;;  %1440 = vset.pattern.permute.xlu1 %v1500_v17 }
  0x57   : > { %859 = vperm.xlu1 %1440, %v1566_v1  }
  0x5b   : > { %1442 = vset.pattern.permute.xlu1 %v1499_v15  ;;  %v1836_v15 = vadd.s32 128, %v1824_v12 }
  0x5c   : > { %784 = vperm.xlu1 %1442, %v1605_v16  }
  0x5d   : > { %2593 = vst [vmem:[#allocation20_spill] sm:$0xff] %v1836_v15  ;;  %vm2566_vm13 = vcmp.lt.s32.totalorder %v1836_v15, 240 }
  0x60   : > { %1443 = vset.pattern.permute.xlu1 %v1501_v18 }
  0x61   : > { %928 = vperm.xlu1 %1443, %v1566_v1  }
  0x65   : > { %1445 = vset.pattern.permute.xlu1 %v1500_v17  ;;  %v402_v17 = vand.u32 15, %v1824_v12 }
  0x66   : > { %855 = vperm.xlu1 %1445, %v1605_v16  }
  0x67   : > { %vm1845_vm3 = vcmp.ge.s32.totalorder %v402_v17, 1  ;;  %vm1879_vm8 = vcmp.le.s32.totalorder %v402_v17, 14 }
  0x68   : > { %vm1860_vm6 = vmand %vm422_vm2, %vm1845_vm3 }
  0x69   : > { %vm1904_vm11 = vmand %vm422_vm2, %vm1879_vm8 }
  0x6a   : > { %1446 = vset.pattern.permute.xlu1 %v1502_v19 }
  0x6b   : > { %999 = vperm.xlu1 %1446, %v1566_v1  }
  0x6f   : > { %1448 = vset.pattern.permute.xlu1 %v1501_v18  ;;  %v409_v18 = vand.u32 15, %v1836_v15 }
  0x70   : > { %924 = vperm.xlu1 %1448, %v1605_v16  }
  0x71   : > { %vm1852_vm5 = vcmp.ge.s32.totalorder %v409_v18, 1  ;;  %vm1896_vm10 = vcmp.le.s32.totalorder %v409_v18, 14 }
  0x72   : > { %vm1944_vm0 = vmand %vm2566_vm13, %vm1852_vm5  ;;  %vm898_vm13 = vcmp.lt.s32.totalorder %v1824_v12, 112 }
  0x74   : > { %1449 = vset.pattern.permute.xlu1 %v1502_v19 }
  0x75   : > { %991 = vperm.xlu1 %1449, %v1580_v4  }
  0x79   : > { %1451 = vset.pattern.permute.xlu1 %v1494_v0 }
  0x89   : > { %v1635_v22 = vpop.permute.xlu0 %446  ;;  %v292_v30 = vpop.permute.xlu1 %291 }
  0x8d   : > { %v1637_v23 = vpop.permute.xlu0 %436  ;;  %v297_v32 = vpop.permute.xlu1 %296 }
  0x92   : > { %v1639_v24 = vpop.permute.xlu0 %571 }
  0x93   : > { %v1655_v35 = vpop.permute.xlu1 %451 }
  0x94   : > { %2578 = vst [vmem:[#allocation5_spill] sm:$0xff] %v1655_v35 }
  0x97   : > { %v1641_v25 = vpop.permute.xlu0 %642 }
  0x98   : > { %v1667_v40 = vpop.permute.xlu1 %510 }
  0x9c   : > { %v1643_v26 = vpop.permute.xlu0 %723 }
  0x9d   : > { %2575 = vst [vmem:[#allocation2_spill] sm:$0xff] %v1643_v26  ;;  %v1679_v42 = vpop.permute.xlu1 %579 }
  0xa0   : > { %v1645_v27 = vpop.permute.xlu0 %711 }
  0xa1   : > { %v1687_v44 = vpop.permute.xlu1 %583 }
  0xa2   : > { %2582 = vst [vmem:[#allocation9_spill] sm:$0xff] %v1687_v44 }
  0xa5   : > { %v1647_v28 = vpop.permute.xlu0 %792 }
  0xa6   : > { %2576 = vst [vmem:[#allocation3_spill] sm:$0xff] %v1647_v28  ;;  %v1701_v48 = vpop.permute.xlu1 %441 }
  0xa9   : > { %v1649_v29 = vpop.permute.xlu0 %780 }
  0xab   : > { %v1709_v51 = vpop.permute.xlu1 %502 }
  0xae   : > { %v1651_v31 = vpop.permute.xlu0 %863 }
  0xaf   : > { %2577 = vst [vmem:[#allocation4_spill] sm:$0xff] %v1651_v31 }
  0xb0   : > { %v1721_v55 = vpop.permute.xlu1 %650 }
  0xb2   : > { %v1653_v33 = vpop.permute.xlu0 %851 }
  0xb4   : > { %v1727_v56 = vpop.permute.xlu1 %654 }
  0xb5   : > { %2584 = vst [vmem:[#allocation11_spill] sm:$0xff] %v1727_v56 }
  0xb7   : > { %v1665_v39 = vpop.permute.xlu0 %932 }
  0xb8   : > { %2579 = vst [vmem:[#allocation6_spill] sm:$0xff] %v1665_v39 }
  0xb9   : > { %v1733_v57 = vpop.permute.xlu1 %575 }
  0xbb   : > { %v1677_v41 = vpop.permute.xlu0 %920 }
  0xbc   : > { %2580 = vst [vmem:[#allocation7_spill] sm:$0xff] %v1677_v41 }
  0xbe   : > { %v1743_v58 = vpop.permute.xlu1 %719 }
  0xc0   : > { %v1685_v43 = vpop.permute.xlu0 %1003 }
  0xc1   : > { %2581 = vst [vmem:[#allocation8_spill] sm:$0xff] %v1685_v43 }
  0xc3   : > { %v1751_v61 = vpop.permute.xlu1 %646 }
  0xc4   : > { %v1697_v46 = vpop.permute.xlu0 %995 }
  0xc5   : > { %2583 = vst [vmem:[#allocation10_spill] sm:$0xff] %v1697_v46 }
  0xc8   : > { %v1761_v62 = vpop.permute.xlu1 %788 }
  0xc9   : > { %v302_v52 = vpop.permute.xlu0 %301  ;;  %2585 = vst [vmem:[#allocation12_spill] sm:$0xff] %v1761_v62 }
  0xcd   : > { %v1767_v63 = vpop.permute.xlu1 %715  ;;  %v307_v0 = vpop.permute.xlu0 %306 }
  0xd2   : > { %v1777_v1 = vpop.permute.xlu1 %859 }
  0xd3   : > { %2586 = vst [vmem:[#allocation13_spill] sm:$0xff] %v1777_v1 }
  0xd7   : > { %v376_v34 = vpop.f32.mrf.mxu0  ;;  %v1785_v4 = vpop.permute.xlu1 %784 }
  0xd8   : > { %v1657_v36 = vadd.f32 %v376_v34, %v292_v30 }
  0xd9   : > { %v378_v37 = vpop.f32.mrf.mxu0 }
  0xda   : > { %533 = vrot.lane.b32.xlu0 %v1657_v36, %s1503_s29  ;;  %462 = vrot.lane.b32.xlu1 %v1657_v36, %s1504_s30  ;;  %v1663_v38 = vadd.f32 %v378_v37, %v292_v30 }
  0xdb   : > { %v380_v45 = vpop.f32.mrf.mxu0 }
  0xdc   : > { %v1699_v47 = vadd.f32 %v380_v45, %v297_v32  ;;  %v1795_v6 = vpop.permute.xlu1 %928 }
  0xdd   : > { %v382_v49 = vpop.f32.mrf.mxu0 }
  0xde   : > { %470 = vrot.lane.b32.xlu0 %v1663_v38, %s1504_s30  ;;  %602 = vrot.lane.b32.xlu1 %v1657_v36, %s1505_s8  ;;  %v1707_v50 = vadd.f32 %v382_v49, %v297_v32 }
  0xdf   : > { %v386_v53 = vpop.f32.mrf.mxu0 }
  0xe0   : > { %v1715_v54 = vadd.f32 %v386_v53, %v302_v52 }
  0xe1   : > { %v388_v59 = vpop.f32.mrf.mxu0  ;;  %v1803_v8 = vpop.permute.xlu1 %855 }
  0xe2   : > { %541 = vrot.lane.b32.xlu0 %v1663_v38, %s1503_s29  ;;  %673 = vrot.lane.b32.xlu1 %v1657_v36, %s1506_s9  ;;  %v1749_v60 = vadd.f32 %v388_v59, %v302_v52  ;;  %2589 = vst [vmem:[#allocation16_spill] sm:$0xff] %v1803_v8  ;;  %v455_v59 = vmul.f32 %v1637_v23, %v1663_v38 }
  0xe3   : > { %v390_v2 = vpop.f32.mrf.mxu0 }
  0xe4   : > { %v1779_v3 = vadd.f32 %v390_v2, %v307_v0 }
  0xe5   : > { %v392_v5 = vpop.f32.mrf.mxu0 }
  0xe6   : > { %610 = vrot.lane.b32.xlu0 %v1663_v38, %s1505_s8  ;;  %742 = vrot.lane.b32.xlu1 %v1657_v36, %s1507_s10  ;;  %2587 = vst [vmem:[#allocation14_spill] sm:$0xff] %v1779_v3  ;;  %v1797_v7 = vadd.f32 %v392_v5, %v307_v0  ;;  %v1812_v9 = vpop.permute.xlu1 %999 }
  0xe7   : > { %2590 = vst [vmem:[#allocation17_spill] sm:$0xff] %v1812_v9 }
  0xe8   : > { %2588 = vst [vmem:[#allocation15_spill] sm:$0xff] %v1797_v7 }
  0xea   : > { %681 = vrot.lane.b32.xlu0 %v1663_v38, %s1506_s9  ;;  %811 = vrot.lane.b32.xlu1 %v1657_v36, %s1508_s11 }
  0xeb   : > { %v1818_v11 = vpop.permute.xlu1 %924 }
  0xec   : > { %2591 = vst [vmem:[#allocation18_spill] sm:$0xff] %v1818_v11 }
  0xee   : > { %750 = vrot.lane.b32.xlu0 %v1663_v38, %s1507_s10  ;;  %819 = vrot.lane.b32.xlu1 %v1663_v38, %s1508_s11 }
  0xf0   : > { %v1830_v13 = vpop.permute.xlu1 %991 }
  0xf1   : > { %2592 = vst [vmem:[#allocation19_spill] sm:$0xff] %v1830_v13 }
  0xf2   : > { %813 = vrot.lane.b32.xlu0 %v1699_v47, %s1508_s11  ;;  %464 = vrot.lane.b32.xlu1 %v1699_v47, %s1504_s30 }
  0xf6   : > { %821 = vrot.lane.b32.xlu0 %v1707_v50, %s1508_s11  ;;  %535 = vrot.lane.b32.xlu1 %v1699_v47, %s1503_s29 }
  0xfa   : > { %466 = vrot.lane.b32.xlu0 %v1715_v54, %s1504_s30  ;;  %604 = vrot.lane.b32.xlu1 %v1699_v47, %s1505_s8 }
  0xfe   : > { %537 = vrot.lane.b32.xlu0 %v1715_v54, %s1503_s29  ;;  %675 = vrot.lane.b32.xlu1 %v1699_v47, %s1506_s9 }
 0x102   : > { %606 = vrot.lane.b32.xlu0 %v1715_v54, %s1505_s8  ;;  %744 = vrot.lane.b32.xlu1 %v1699_v47, %s1507_s10 }
 0x106   : > { %746 = vrot.lane.b32.xlu0 %v1715_v54, %s1507_s10  ;;  %472 = vrot.lane.b32.xlu1 %v1707_v50, %s1504_s30 }
 0x10a   : > { %815 = vrot.lane.b32.xlu0 %v1715_v54, %s1508_s11  ;;  %543 = vrot.lane.b32.xlu1 %v1707_v50, %s1503_s29 }
 0x10e   : > { %886 = vrot.lane.b32.xlu0 %v1715_v54, %s1509_s12  ;;  %612 = vrot.lane.b32.xlu1 %v1707_v50, %s1505_s8 }
 0x112   : > { %474 = vrot.lane.b32.xlu0 %v1749_v60, %s1504_s30  ;;  %683 = vrot.lane.b32.xlu1 %v1707_v50, %s1506_s9 }
 0x116   : > { %545 = vrot.lane.b32.xlu0 %v1749_v60, %s1503_s29  ;;  %752 = vrot.lane.b32.xlu1 %v1707_v50, %s1507_s10 }
 0x11a   : > { %614 = vrot.lane.b32.xlu0 %v1749_v60, %s1505_s8  ;;  %677 = vrot.lane.b32.xlu1 %v1715_v54, %s1506_s9 }
 0x11e   : > { %685 = vrot.lane.b32.xlu0 %v1749_v60, %s1506_s9  ;;  %955 = vrot.lane.b32.xlu1 %v1715_v54, %s1510_s13 }
 0x122   : > { %754 = vrot.lane.b32.xlu0 %v1749_v60, %s1507_s10  ;;  %963 = vrot.lane.b32.xlu1 %v1749_v60, %s1510_s13 }
 0x126   : > { %823 = vrot.lane.b32.xlu0 %v1749_v60, %s1508_s11  ;;  %468 = vrot.lane.b32.xlu1 %v1779_v3, %s1504_s30 }
 0x12a   : > { %894 = vrot.lane.b32.xlu0 %v1749_v60, %s1509_s12  ;;  %539 = vrot.lane.b32.xlu1 %v1779_v3, %s1503_s29 }
 0x12e   : > { %957 = vrot.lane.b32.xlu0 %v1779_v3, %s1510_s13  ;;  %608 = vrot.lane.b32.xlu1 %v1779_v3, %s1505_s8 }
 0x132   : > { %965 = vrot.lane.b32.xlu0 %v1797_v7, %s1510_s13  ;;  %679 = vrot.lane.b32.xlu1 %v1779_v3, %s1506_s9 }
 0x136   : > { %506 = vperm.xlu0 %1450, %v1605_v16   ;;  %748 = vrot.lane.b32.xlu1 %v1779_v3, %s1507_s10  ;;  %v1838_v16 = vpop.permute.xlu0 %514 }
 0x137   : > { %2594 = vst [vmem:[#allocation21_spill] sm:$0xff] %v1838_v16 }
 0x13a   : > { %882 = vrot.lane.b32.xlu0 %v1657_v36, %s1509_s12  ;;  %817 = vrot.lane.b32.xlu1 %v1779_v3, %s1508_s11 }
 0x13e   : > { %890 = vrot.lane.b32.xlu0 %v1663_v38, %s1509_s12  ;;  %888 = vrot.lane.b32.xlu1 %v1779_v3, %s1509_s12 }
 0x142   : > { %951 = vrot.lane.b32.xlu0 %v1657_v36, %s1510_s13  ;;  %476 = vrot.lane.b32.xlu1 %v1797_v7, %s1504_s30 }
 0x146   : > { %959 = vrot.lane.b32.xlu0 %v1663_v38, %s1510_s13  ;;  %547 = vrot.lane.b32.xlu1 %v1797_v7, %s1503_s29 }
 0x14a   : > { %1028 = vperm.xlu0 %1450, %v1022_v14   ;;  %616 = vrot.lane.b32.xlu1 %v1797_v7, %s1505_s8  ;;  %s278_s8 = scalar_lea.vmem %s2547_s7, %s1397_s28 }
 0x14c   : > { %v534_v19 = vpop.permute.xlu0 %533  ;;  %v463_v20 = vpop.permute.xlu1 %462 }
 0x14e   : > { %687 = vrot.lane.b32.xlu1 %v1797_v7, %s1506_s9 }
 0x150   : > { %v471_v34 = vpop.permute.xlu0 %470  ;;  %v603_v37 = vpop.permute.xlu1 %602 }
 0x151   : > { %v479_v45 = vsel %vm478_vm4, %v463_v20, %v471_v34  ;;  %v483_v49 = vsel %vm478_vm4, %v471_v34, %v463_v20  ;;  %v454_v20 = vmul.f32 %v1637_v23, %v1657_v36 }
 0x152   : > { %v493_v52 = vsel %vm1860_vm6, %v483_v49, 0.0  ;;  %v494_v53 = vsel %vm1852_vm5, %v479_v45, 0.0  ;;  %756 = vrot.lane.b32.xlu1 %v1797_v7, %s1507_s10 }
 0x153   : > { %v517_v0 = vmul.f32 %v1709_v51, %v493_v52  ;;  %v518_v2 = vmul.f32 %v1709_v51, %v494_v53 }
 0x154   : > { %v542_v5 = vpop.permute.xlu0 %541  ;;  %v674_v10 = vpop.permute.xlu1 %673 }
 0x155   : > { %v526_v34 = vadd.f32 %v518_v2, %v455_v59  ;;  %v550_v45 = vsel %vm549_vm7, %v534_v19, %v542_v5  ;;  %v554_v38 = vsel %vm549_vm7, %v542_v5, %v534_v19  ;;  %v525_v17 = vadd.f32 %v517_v0, %v454_v20 }
 0x156   : > { %v562_v49 = vsel %vm422_vm2, %v554_v38, 0.0  ;;  %v587_v51 = vmul.f32 %v1639_v24, %v550_v45  ;;  %825 = vrot.lane.b32.xlu1 %v1797_v7, %s1508_s11  ;;  %v1024_v45 = vld [vmem:[%s2544_s4 + $0x10] sm:$0xff] }
 0x157   : > { %v586_v23 = vmul.f32 %v1639_v24, %v562_v49 }
 0x158   : > { %v595_v52 = vadd.f32 %v587_v51, %v526_v34  ;;  %v611_v53 = vpop.permute.xlu0 %610  ;;  %v743_v59 = vpop.permute.xlu1 %742 }
 0x159   : > { %v594_v2 = vadd.f32 %v586_v23, %v525_v17  ;;  %v619_v0 = vsel %vm618_vm9, %v603_v37, %v611_v53  ;;  %v623_v24 = vsel %vm618_vm9, %v611_v53, %v603_v37 }
 0x15a   : > { %v633_v18 = vsel %vm1904_vm11, %v623_v24, 0.0  ;;  %v634_v5 = vsel %vm1896_vm10, %v619_v0, 0.0  ;;  %896 = vrot.lane.b32.xlu1 %v1797_v7, %s1509_s12 }
 0x15b   : > { %v657_v20 = vmul.f32 %v1641_v25, %v633_v18  ;;  %v658_v34 = vmul.f32 %v1641_v25, %v634_v5 }
 0x15c   : > { %v682_v37 = vpop.permute.xlu0 %681  ;;  %v812_v38 = vpop.permute.xlu1 %811 }
 0x15d   : > { %v665_v49 = vadd.f32 %v657_v20, %v594_v2  ;;  %v666_v51 = vadd.f32 %v658_v34, %v595_v52  ;;  %v690_v17 = vsel %vm2574_vm12, %v674_v10, %v682_v37  ;;  %v694_v23 = vsel %vm2574_vm12, %v682_v37, %v674_v10  ;;  %v1025_v52 = vld [vmem:[%s2544_s4 + $0x18] sm:$0xff] }
 0x15e   : > { %v702_v53 = vsel %vm1845_vm3, %v694_v23, 0.0  ;;  %v703_v25 = vsel %vm1852_vm5, %v690_v17, 0.0  ;;  %1038 = vperm.xlu1 %1451, %v1024_v45  }
 0x15f   : > { %v726_v0 = vmul.f32 %v1645_v27, %v702_v53  ;;  %v727_v2 = vmul.f32 %v1645_v27, %v703_v25 }
 0x160   : > { %v751_v10 = vpop.permute.xlu0 %750  ;;  %v820_v18 = vpop.permute.xlu1 %819 }
 0x161   : > { %v734_v5 = vadd.f32 %v726_v0, %v665_v49  ;;  %v735_v20 = vadd.f32 %v727_v2, %v666_v51  ;;  %v759_v27 = vsel %vm758_vm14, %v743_v59, %v751_v10  ;;  %v763_v34 = vsel %vm758_vm14, %v751_v10, %v743_v59 }
 0x162   : > { %v771_v45 = vsel %vm1879_vm8, %v759_v27, 0.0  ;;  %v772_v37 = vsel %vm1896_vm10, %v763_v34, 0.0  ;;  %v828_v17 = vsel %vm827_vm15, %v812_v38, %v820_v18  ;;  %v832_v23 = vsel %vm827_vm15, %v820_v18, %v812_v38  ;;  %1043 = vperm.xlu1 %1451, %v1025_v52  }
 0x163   : > { %v795_v49 = vmul.f32 %v1649_v29, %v771_v45  ;;  %v796_v51 = vmul.f32 %v1649_v29, %v772_v37  ;;  %v842_v59 = vsel %vm1845_vm3, %v828_v17, 0.0  ;;  %v843_v53 = vsel %vm1944_vm0, %v832_v23, 0.0  ;;  %v1023_v23 = vld [vmem:[%s2544_s4 + $0x8] sm:$0xff] }
 0x164   : > { %v814_v25 = vpop.permute.xlu0 %813  ;;  %v465_v0 = vpop.permute.xlu1 %464  ;;  %v866_v27 = vmul.f32 %v1653_v33, %v842_v59  ;;  %v867_v34 = vmul.f32 %v1653_v33, %v843_v53  ;;  %v1267_v59 = vld [vmem:[%s2546_s6] sm:$0xf] }
 0x165   : > { %v803_v2 = vadd.f32 %v795_v49, %v734_v5  ;;  %v804_v10 = vadd.f32 %v796_v51, %v735_v20 }
 0x166   : > { %884 = vrot.lane.b32.xlu1 %v1699_v47, %s1509_s12 }
 0x167   : > { %v1970_v38 = vadd.f32 %v866_v27, %v803_v2  ;;  %v1972_v29 = vadd.f32 %v867_v34, %v804_v10 }
 0x168   : > { %v822_v52 = vpop.permute.xlu0 %821  ;;  %v536_v18 = vpop.permute.xlu1 %535 }
 0x169   : > { %2609 = vst [vmem:[#allocation22_spill] sm:$0xff] %v1970_v38  ;;  %2610 = vst [vmem:[#allocation23_spill] sm:$0xff] %v1972_v29  ;;  %v1976_v45 = vsel %vm827_vm15, %v814_v25, %v822_v52  ;;  %v1980_v5 = vsel %vm827_vm15, %v822_v52, %v814_v25  ;;  %v458_v38 = vmul.f32 %v1635_v22, %v1715_v54 }
 0x16a   : > { %892 = vrot.lane.b32.xlu1 %v1707_v50, %s1509_s12 }
 0x16c   : > { %v1984_v33 = vpop.permute.xlu0 %466  ;;  %v605_v20 = vpop.permute.xlu1 %604 }
 0x16e   : > { %953 = vrot.lane.b32.xlu1 %v1699_v47, %s1510_s13 }
 0x170   : > { %v1988_v37 = vpop.permute.xlu0 %537  ;;  %v676_v17 = vpop.permute.xlu1 %675 }
 0x172   : > { %961 = vrot.lane.b32.xlu1 %v1707_v50, %s1510_s13 }
 0x174   : > { %v1995_v49 = vpop.permute.xlu0 %606  ;;  %v745_v51 = vpop.permute.xlu1 %744 }
 0x176   : > { %1033 = vperm.xlu1 %1451, %v1023_v23  }
 0x178   : > { %v2000_v53 = vpop.permute.xlu0 %746  ;;  %v473_v25 = vpop.permute.xlu1 %472 }
 0x179   : > { %v2004_v2 = vsel %vm478_vm4, %v465_v0, %v473_v25  ;;  %v2008_v10 = vsel %vm478_vm4, %v473_v25, %v465_v0 }
 0x17a   : > { %1270 = vperm.xlu1 %1451, %v1267_v59  }
 0x17c   : > { %v2010_v27 = vpop.permute.xlu0 %815  ;;  %v544_v34 = vpop.permute.xlu1 %543 }
 0x17d   : > { %v2014_v52 = vsel %vm549_vm7, %v536_v18, %v544_v34  ;;  %v2018_v23 = vsel %vm549_vm7, %v544_v34, %v536_v18 }
 0x180   : > { %v2020_v46 = vpop.permute.xlu0 %886  ;;  %v613_v11 = vpop.permute.xlu1 %612 }
 0x181   : > { %v2024_v43 = vsel %vm618_vm9, %v605_v20, %v613_v11  ;;  %v2028_v0 = vsel %vm618_vm9, %v613_v11, %v605_v20 }
 0x184   : > { %v475_v59 = vpop.permute.xlu0 %474  ;;  %v684_v25 = vpop.permute.xlu1 %683 }
 0x185   : > { %v2032_v39 = vsel %vm2574_vm12, %v676_v17, %v684_v25  ;;  %v2036_v18 = vsel %vm2574_vm12, %v684_v25, %v676_v17  ;;  %v485_v28 = vsel %vm478_vm4, %v475_v59, %v1984_v33 }
 0x186   : > { %v497_v25 = vsel %vm1860_vm6, %v485_v28, 0.0 }
 0x188   : > { %v2038_v34 = vpop.permute.xlu0 %545  ;;  %v753_v31 = vpop.permute.xlu1 %752 }
 0x189   : > { %v2045_v11 = vsel %vm758_vm14, %v745_v51, %v753_v31  ;;  %v2049_v20 = vsel %vm758_vm14, %v753_v31, %v745_v51  ;;  %v556_v17 = vsel %vm549_vm7, %v2038_v34, %v1988_v37  ;;  %v521_v51 = vmul.f32 %v1667_v40, %v497_v25 }
 0x18a   : > { %v566_v31 = vsel %vm422_vm2, %v556_v17, 0.0 }
 0x18b   : > { %v590_v13 = vmul.f32 %v1679_v42, %v566_v31  ;;  %v529_v25 = vadd.f32 %v521_v51, %v458_v38 }
 0x18c   : > { %v2057_v26 = vpop.permute.xlu0 %614  ;;  %v2059_v56 = vpop.permute.xlu1 %677 }
 0x18d   : > { %v625_v44 = vsel %vm618_vm9, %v2057_v26, %v1995_v49  ;;  %v598_v3 = vadd.f32 %v590_v13, %v529_v25 }
 0x18e   : > { %v637_v29 = vsel %vm1904_vm11, %v625_v44, 0.0 }
 0x18f   : > { %v661_v44 = vmul.f32 %v1721_v55, %v637_v29 }
 0x190   : > { %v2070_v16 = vpop.permute.xlu0 %685  ;;  %v2072_v28 = vpop.permute.xlu1 %955 }
 0x191   : > { %2611 = vst [vmem:[#allocation24_spill] sm:$0xff] %v2072_v28  ;;  %v696_v41 = vsel %vm2574_vm12, %v2070_v16, %v2059_v56  ;;  %v669_v8 = vadd.f32 %v661_v44, %v598_v3 }
 0x192   : > { %v706_v17 = vsel %vm1845_vm3, %v696_v41, 0.0 }
 0x193   : > { %v730_v54 = vmul.f32 %v1743_v58, %v706_v17 }
 0x194   : > { %v2084_v7 = vpop.permute.xlu0 %754  ;;  %v2086_v35 = vpop.permute.xlu1 %963 }
 0x195   : > { %2612 = vst [vmem:[#allocation25_spill] sm:$0xff] %v2086_v35  ;;  %v761_v31 = vsel %vm758_vm14, %v2000_v53, %v2084_v7  ;;  %v738_v13 = vadd.f32 %v730_v54, %v669_v8  ;;  %v970_v17 = vsel %vm967_vm1, %v2072_v28, %v2086_v35 }
 0x196   : > { %v775_v15 = vsel %vm1879_vm8, %v761_v31, 0.0  ;;  %v986_v54 = vsel %vm1879_vm8, %v970_v17, 0.0 }
 0x197   : > { %v799_v41 = vmul.f32 %v1761_v62, %v775_v15  ;;  %v1010_v28 = vmul.f32 %v1812_v9, %v986_v54  ;;  %v456_v54 = vmul.f32 %v1701_v48, %v1699_v47  ;;  %v635_v47 = vsel %vm1904_vm11, %v2028_v0, 0.0 }
 0x198   : > { %v2097_v38 = vpop.permute.xlu0 %823  ;;  %v2099_v29 = vpop.permute.xlu1 %468 }
 0x199   : > { %v830_v51 = vsel %vm827_vm15, %v2010_v27, %v2097_v38  ;;  %v807_v15 = vadd.f32 %v799_v41, %v738_v13 }
 0x19a   : > { %v846_v3 = vsel %vm1845_vm3, %v830_v51, 0.0 }
 0x19b   : > { %v870_v25 = vmul.f32 %v1777_v1, %v846_v3 }
 0x19c   : > { %v2113_v44 = vpop.permute.xlu0 %894  ;;  %v2115_v8 = vpop.permute.xlu1 %539 }
 0x19d   : > { %v878_v31 = vadd.f32 %v870_v25, %v807_v15  ;;  %v901_v35 = vsel %vm898_vm13, %v2020_v46, %v2113_v44 }
 0x19e   : > { %v939_v51 = vmul.f32 %v1795_v6, %v901_v35  ;;  %v481_v35 = vsel %vm478_vm4, %v1984_v33, %v475_v59  ;;  %v496_v33 = vsel %vm1852_vm5, %v2004_v2, 0.0  ;;  %v704_v2 = vsel %vm1845_vm3, %v2036_v18, 0.0 }
 0x19f   : > { %v498_v59 = vsel %vm1852_vm5, %v481_v35, 0.0  ;;  %v659_v35 = vmul.f32 %v1751_v61, %v635_v47 }
 0x1a0   : > { %v947_v41 = vadd.f32 %v939_v51, %v878_v31  ;;  %v2125_v13 = vpop.permute.xlu1 %608  ;;  %v2131_v62 = vpop.permute.xlu0 %957  ;;  %v457_v51 = vmul.f32 %v1701_v48, %v1707_v50  ;;  %v589_v48 = vmul.f32 %v1733_v57, %v2014_v52  ;;  %v636_v50 = vsel %vm1896_vm10, %v2024_v43, 0.0 }
 0x1a1   : > { %2614 = vst [vmem:[#allocation27_spill] sm:$0xff] %v2131_v62  ;;  %v705_v52 = vsel %vm1852_vm5, %v2032_v39, 0.0  ;;  %v621_v43 = vsel %vm618_vm9, %v1995_v49, %v2057_v26  ;;  %v728_v39 = vmul.f32 %v1767_v63, %v704_v2  ;;  %v692_v26 = vsel %vm2574_vm12, %v2059_v56, %v2070_v16 }
 0x1a2   : > { %v2127_v3 = vadd.f32 %v1010_v28, %v947_v41  ;;  %v564_v28 = vsel %vm422_vm2, %v2018_v23, 0.0  ;;  %v707_v16 = vsel %vm1852_vm5, %v692_v26, 0.0 }
 0x1a4   : > { %2613 = vst [vmem:[#allocation26_spill] sm:$0xff] %v2127_v3  ;;  %v2129_v1 = vpop.permute.xlu1 %679  ;;  %v2137_v25 = vpop.permute.xlu0 %965  ;;  %v495_v3 = vsel %vm1860_vm6, %v2008_v10, 0.0  ;;  %v588_v10 = vmul.f32 %v1733_v57, %v564_v28  ;;  %v660_v28 = vmul.f32 %v1751_v61, %v636_v50  ;;  %v729_v61 = vmul.f32 %v1767_v63, %v705_v52  ;;  %v2617_v52 = vld [vmem:[#allocation20_spill] sm:$0xff] }
 0x1a5   : > { %2615 = vst [vmem:[#allocation28_spill] sm:$0xff] %v2137_v25  ;;  %vm2618_vm12 = vcmp.lt.s32.totalorder %v2617_v52, 240 }
 0x1a8   : > { %v2133_v17 = vpop.permute.xlu1 %748 }
 0x1ac   : > { %v2135_v15 = vpop.permute.xlu1 %817 }
 0x1b0   : > { %v2144_v31 = vpop.permute.xlu1 %888 }
 0x1b1   : > { %v507_v41 = vpop.permute.xlu0 %506 }
 0x1b2   : > { %v519_v23 = vmul.f32 %v507_v41, %v495_v3  ;;  %v520_v9 = vmul.f32 %v507_v41, %v496_v33  ;;  %v522_v3 = vmul.f32 %v1667_v40, %v498_v59  ;;  %v459_v40 = vmul.f32 %v1635_v22, %v1749_v60 }
 0x1b3   : > { %v844_v22 = vsel %vm1845_vm3, %v1976_v45, 0.0  ;;  %v774_v41 = vsel %vm1896_vm10, %v2049_v20, 0.0 }
 0x1b4   : > { %v527_v62 = vadd.f32 %v519_v23, %v456_v54  ;;  %v528_v0 = vadd.f32 %v520_v9, %v457_v51  ;;  %v477_v25 = vpop.permute.xlu1 %476  ;;  %v552_v9 = vsel %vm549_vm7, %v1988_v37, %v2038_v34  ;;  %v773_v51 = vsel %vm1879_vm8, %v2045_v11, 0.0  ;;  %v2616_v23 = vld [vmem:[#allocation16_spill] sm:$0xff] }
 0x1b5   : > { %v883_v57 = vpop.permute.xlu0 %882  ;;  %v530_v60 = vadd.f32 %v522_v3, %v459_v40  ;;  %v591_v11 = vmul.f32 %v1679_v42, %v552_v9  ;;  %v797_v63 = vmul.f32 %v1785_v4, %v773_v51  ;;  %v845_v42 = vsel %vm1944_vm0, %v1980_v5, 0.0 }
 0x1b6   : > { %v596_v18 = vadd.f32 %v588_v10, %v527_v62  ;;  %v597_v54 = vadd.f32 %v589_v48, %v528_v0  ;;  %v638_v62 = vsel %vm1896_vm10, %v621_v43, 0.0  ;;  %v868_v48 = vmul.f32 %v2616_v23, %v844_v22 }
 0x1b7   : > { %v662_v59 = vmul.f32 %v1721_v55, %v638_v62  ;;  %v599_v10 = vadd.f32 %v591_v11, %v530_v60  ;;  %v798_v2 = vmul.f32 %v1785_v4, %v774_v41  ;;  %v731_v0 = vmul.f32 %v1743_v58, %v707_v16 }
 0x1b8   : > { %v667_v37 = vadd.f32 %v659_v35, %v596_v18  ;;  %v668_v49 = vadd.f32 %v660_v28, %v597_v54  ;;  %v548_v34 = vpop.permute.xlu1 %547  ;;  %v765_v3 = vsel %vm758_vm14, %v2084_v7, %v2000_v53  ;;  %v486_v5 = vsel %vm478_vm4, %v477_v25, %v2099_v29  ;;  %v2619_v18 = vld [vmem:[#allocation14_spill] sm:$0xff]  ;;  %v2620_v54 = vld [vmem:[#allocation5_spill] sm:$0xff]  ;;  %v2621_v53 = vld [vmem:[#allocation15_spill] sm:$0xff] }
 0x1b9   : > { %v891_v56 = vpop.permute.xlu0 %890  ;;  %v670_v4 = vadd.f32 %v662_v59, %v599_v10  ;;  %v482_v58 = vsel %vm478_vm4, %v2099_v29, %v477_v25  ;;  %v869_v9 = vmul.f32 %v2616_v23, %v845_v42  ;;  %v460_v7 = vmul.f32 %v2620_v54, %v2619_v18  ;;  %vm2623_vm4 = vmmov %vm2618_vm12  ;;  %v2627_v42 = vld [vmem:[#allocation22_spill] sm:$0xff] }
 0x1ba   : > { %v736_v33 = vadd.f32 %v728_v39, %v667_v37  ;;  %v737_v47 = vadd.f32 %v729_v61, %v668_v49  ;;  %v903_v45 = vsel %vm898_vm13, %v891_v56, %v883_v57  ;;  %v899_v35 = vsel %vm898_vm13, %v883_v57, %v891_v56  ;;  %v2622_v39 = vld [vmem:[#allocation7_spill] sm:$0xff] }
 0x1bb   : > { %v912_v43 = vsel %vm2618_vm12, %v903_v45, 0.0  ;;  %v461_v40 = vmul.f32 %v2620_v54, %v2621_v53  ;;  %v935_v51 = vmul.f32 %v2622_v39, %v899_v35  ;;  %v2239_v61 = vadd.f32 %v731_v0, %v670_v4  ;;  %vm2250_vm12 = vmand %vm2623_vm4, %vm1896_vm10  ;;  %v2630_v35 = vld [vmem:[#allocation12_spill] sm:$0xff] }
 0x1bc   : > { %v617_v20 = vpop.permute.xlu1 %616  ;;  %v805_v50 = vadd.f32 %v797_v63, %v736_v33  ;;  %v806_v57 = vadd.f32 %v798_v2, %v737_v47  ;;  %v776_v62 = vsel %vm1896_vm10, %v765_v3, 0.0  ;;  %v499_v29 = vsel %vm1860_vm6, %v486_v5, 0.0  ;;  %v2626_v33 = vld [vmem:[#allocation19_spill] sm:$0xff]  ;;  %v2631_v3 = vld [vmem:[#allocation24_spill] sm:$0xff]  ;;  %v2632_v5 = vld [vmem:[#allocation25_spill] sm:$0xff] }
 0x1bd   : > { %v952_v55 = vpop.permute.xlu0 %951  ;;  %v936_v25 = vmul.f32 %v2622_v39, %v912_v43  ;;  %v500_v22 = vsel %vm1852_vm5, %v482_v58, 0.0  ;;  %v557_v60 = vsel %vm549_vm7, %v548_v34, %v2115_v8  ;;  %v834_v41 = vsel %vm827_vm15, %v2097_v38, %v2010_v27  ;;  %v2628_v27 = vld [vmem:[#allocation21_spill] sm:$0xff]  ;;  %v2629_v2 = vld [vmem:[#allocation23_spill] sm:$0xff] }
 0x1be   : > { %v2228_v28 = vadd.f32 %v868_v48, %v805_v50  ;;  %v626_v56 = vsel %vm618_vm9, %v617_v20, %v2125_v13  ;;  %v943_v23 = vadd.f32 %v935_v51, %v2627_v42  ;;  %v2277_v48 = vadd.f32 %v869_v9, %v806_v57 }
 0x1bf   : > { %v523_v38 = vmul.f32 %v2628_v27, %v499_v29  ;;  %v524_v50 = vmul.f32 %v2628_v27, %v500_v22  ;;  %v568_v10 = vsel %vm422_vm2, %v557_v60, 0.0  ;;  %v944_v0 = vadd.f32 %v936_v25, %v2629_v2 }
 0x1c0   : > { %v688_v26 = vpop.permute.xlu1 %687  ;;  %v2289_v43 = vsel %vm967_vm1, %v2632_v5, %v2631_v3  ;;  %v553_v4 = vsel %vm549_vm7, %v2115_v8, %v548_v34  ;;  %v622_v57 = vsel %vm618_vm9, %v2125_v13, %v617_v20  ;;  %v639_v9 = vsel %vm1904_vm11, %v626_v56, 0.0  ;;  %v2634_v34 = vld [vmem:[#allocation9_spill] sm:$0xff]  ;;  %vm2638_vm7 = vmmov %vm2623_vm4 }
 0x1c1   : > { %v960_v37 = vpop.permute.xlu0 %959  ;;  %vm2633_vm2 = vcmp.lt.s32.totalorder %v1824_v12, 1  ;;  %v847_v39 = vsel %vm1944_vm0, %v834_v41, 0.0  ;;  %v905_v8 = vsel %vm898_vm13, %v2113_v44, %v2020_v46  ;;  %v592_v51 = vmul.f32 %v2634_v34, %v568_v10  ;;  %v2636_v44 = vld [vmem:[#allocation11_spill] sm:$0xff] }
 0x1c2   : > { %v968_v32 = vsel %vm967_vm1, %v952_v55, %v960_v37  ;;  %v972_v11 = vsel %vm967_vm1, %v960_v37, %v952_v55  ;;  %v800_v55 = vmul.f32 %v2630_v35, %v776_v62  ;;  %v697_v18 = vsel %vm2633_vm2, %v688_v26, %v2129_v1  ;;  %vm2635_vm6 = vmmov %vm2633_vm2 }
 0x1c3   : > { %v982_v63 = vsel %vm1879_vm8, %v968_v32, 0.0  ;;  %v983_v16 = vsel %vm2250_vm12, %v972_v11, 0.0  ;;  %v531_v20 = vadd.f32 %v523_v38, %v460_v7  ;;  %v532_v62 = vadd.f32 %v524_v50, %v461_v40  ;;  %v2637_v7 = vld [vmem:[#allocation13_spill] sm:$0xff]  ;;  %v2640_v50 = vld [vmem:[#allocation3_spill] sm:$0xff] }
 0x1c4   : > { %v1006_v47 = vmul.f32 %v2626_v33, %v982_v63  ;;  %v1007_v59 = vmul.f32 %v2626_v33, %v983_v16  ;;  %v757_v45 = vpop.permute.xlu1 %756  ;;  %v693_v29 = vsel %vm2635_vm6, %v2129_v1, %v688_v26  ;;  %v593_v37 = vmul.f32 %v2634_v34, %v553_v4 }
 0x1c5   : > { %v1029_v54 = vpop.permute.xlu0 %1028  ;;  %v762_v25 = vsel %vm758_vm14, %v2133_v17, %v757_v45  ;;  %v640_v46 = vsel %vm1896_vm10, %v622_v57, 0.0  ;;  %v663_v22 = vmul.f32 %v2636_v44, %v639_v9  ;;  %v708_v60 = vsel %vm1845_vm3, %v697_v18, 0.0 }
 0x1c6   : > { %v1014_v58 = vadd.f32 %v1006_v47, %v943_v23  ;;  %v1015_v53 = vadd.f32 %v1007_v59, %v944_v0  ;;  %v871_v40 = vmul.f32 %v2637_v7, %v847_v39  ;;  %v766_v1 = vsel %vm758_vm14, %v757_v45, %v2133_v17  ;;  %v2639_v47 = vld [vmem:[#allocation2_spill] sm:$0xff]  ;;  %v2643_v39 = vld [vmem:[#allocation28_spill] sm:$0xff] }
 0x1c7   : > { %v600_v11 = vadd.f32 %v592_v51, %v531_v20  ;;  %v709_v41 = vsel %vm1852_vm5, %v693_v29, 0.0  ;;  %v777_v56 = vsel %vm1879_vm8, %v762_v25, 0.0  ;;  %v916_v17 = vsel %vm2638_vm7, %v905_v8, 0.0  ;;  %v2644_v8 = vld [vmem:[#allocation27_spill] sm:$0xff] }
 0x1c8   : > { %v2309_v13 = vadd.f32 %v1029_v54, %v1014_v58  ;;  %v826_v19 = vpop.permute.xlu1 %825  ;;  %v2327_v26 = vadd.f32 %v1029_v54, %v1015_v53  ;;  %v664_v33 = vmul.f32 %v2636_v44, %v640_v46  ;;  %v732_v59 = vmul.f32 %v2639_v47, %v708_v60  ;;  %v2641_v58 = vld [vmem:[#allocation4_spill] sm:$0xff] }
 0x1c9   : > { %v831_v32 = vsel %vm827_vm15, %v2135_v15, %v826_v19  ;;  %v835_v45 = vsel %vm827_vm15, %v826_v19, %v2135_v15  ;;  %v601_v30 = vadd.f32 %v593_v37, %v532_v62  ;;  %v671_v42 = vadd.f32 %v663_v22, %v600_v11  ;;  %v2645_v62 = vld [vmem:[#allocation6_spill] sm:$0xff]  ;;  %v2646_v37 = vld [vmem:[#allocation17_spill] sm:$0xff] }
 0x1ca   : > { %v2337_v63 = vmul.f32 0.70710677, %v2309_v13  ;;  %v778_v23 = vsel %vm1896_vm10, %v766_v1, 0.0  ;;  %v848_v27 = vsel %vm1845_vm3, %v831_v32, 0.0  ;;  %v733_v38 = vmul.f32 %v2639_v47, %v709_v41  ;;  %vm2642_vm3 = vmmov %vm2623_vm4 }
 0x1cb   : > { %v801_v10 = vmul.f32 %v2640_v50, %v777_v56  ;;  %v2353_v2 = vmul.f32 0.70710677, %v2327_v26  ;;  %v808_v15 = vadd.f32 %v800_v55, %v2239_v61  ;;  %v940_v35 = vmul.f32 %v1795_v6, %v916_v17  ;;  %v2647_v56 = vld [vmem:[#allocation26_spill] sm:$0xff]  ;;  %vm2649_vm5 = vmmov %vm2642_vm3 }
 0x1cc   : > { %v897_v16 = vpop.permute.xlu1 %896  ;;  %v2361_v36 = vand.u32 2147483647, %v2337_v63  ;;  %v849_v21 = vsel %vm1944_vm0, %v835_v45, 0.0  ;;  %v672_v3 = vadd.f32 %v664_v33, %v601_v30  ;;  %v740_v5 = vadd.f32 %v732_v59, %v671_v42  ;;  %v2648_v33 = vld [vmem:[#allocation8_spill] sm:$0xff] }
 0x1cd   : > { %v906_v0 = vsel %vm898_vm13, %v897_v16, %v2144_v31  ;;  %v802_v4 = vmul.f32 %v2640_v50, %v778_v23  ;;  %v872_v57 = vmul.f32 %v2641_v58, %v848_v27  ;;  %v987_v9 = vsel %vm2250_vm12, %v2289_v43, 0.0 }
 0x1ce   : > { %v879_v18 = vadd.f32 %v871_v40, %v808_v15  ;;  %v902_v6 = vsel %vm898_vm13, %v2144_v31, %v897_v16  ;;  %v918_v61 = vsel %vm2642_vm3, %v906_v0, 0.0  ;;  %v741_v24 = vadd.f32 %v733_v38, %v672_v3 }
 0x1cf   : > { %v809_v55 = vadd.f32 %v801_v10, %v740_v5  ;;  %v2376_v54 = vand.u32 2147483647, %v2353_v2  ;;  %v873_v53 = vmul.f32 %v2641_v58, %v849_v21  ;;  %v971_v43 = vsel %vm967_vm1, %v2644_v8, %v2643_v39 }
 0x1d0   : > { %v975_v31 = vsel %vm967_vm1, %v2643_v39, %v2644_v8  ;;  %v1070_v34 = vmul.f32 0.3275911, %v2361_v36  ;;  %v948_v51 = vadd.f32 %v940_v35, %v879_v18  ;;  %v810_v19 = vadd.f32 %v802_v4, %v741_v24 }
 0x1d1   : > { %v880_v20 = vadd.f32 %v872_v57, %v809_v55  ;;  %v941_v29 = vmul.f32 %v2645_v62, %v902_v6  ;;  %v942_v25 = vmul.f32 %v2645_v62, %v918_v61  ;;  %v1011_v46 = vmul.f32 %v2646_v37, %v987_v9 }
 0x1d2   : > { %v1071_v44 = vmul.f32 0.3275911, %v2376_v54  ;;  %v881_v22 = vadd.f32 %v873_v53, %v810_v19  ;;  %v988_v60 = vsel %vm1879_vm8, %v971_v43, 0.0  ;;  %v989_v7 = vsel %vm2250_vm12, %v975_v31, 0.0 }
 0x1d3   : > { %v1078_v40 = vadd.f32 1.0, %v1070_v34  ;;  %v1019_v1 = vadd.f32 %v1011_v46, %v948_v51  ;;  %v949_v32 = vadd.f32 %v941_v29, %v880_v20  ;;  %v1012_v47 = vmul.f32 %v2648_v33, %v988_v60  ;;  %v2650_v20 = vld [vmem:[#allocation18_spill] sm:$0xff] }
 0x1d4   : > { %v950_v41 = vadd.f32 %v942_v25, %v881_v22  ;;  %v1013_v59 = vmul.f32 %v2648_v33, %v989_v7  ;;  %v1079_v45 = vadd.f32 1.0, %v1071_v44  ;;  %vm1215_vm14 = vcmp.ge.f32.partialorder %v2353_v2, 0.0 }
 0x1d5   : > { %1454 = vrcp.f32 %v1078_v40  ;;  %v1020_v23 = vadd.f32 %v1012_v47, %v949_v32  ;;  %v1239_v2 = vmul.f32 0.5, %v2327_v26 }
 0x1d6   : > { %v1021_v27 = vadd.f32 %v1013_v59, %v950_v41  ;;  %1456 = vrcp.f32 %v1079_v45  ;;  %v2651_v41 = vld [vmem:[#allocation10_spill] sm:$0xff] }
 0x1d9   : > { %v1039_v11 = vpop.permute.xlu1 %1038 }
 0x1da   : > { %v2397_v16 = vadd.f32 %v1039_v11, %v2647_v56  ;;  %v2399_v17 = vadd.f32 %v1039_v11, %v1019_v1 }
 0x1dc   : > { %v2404_v30 = vmul.f32 0.70710677, %v2397_v16  ;;  %v2407_v42 = vmul.f32 0.70710677, %v2399_v17 }
 0x1dd   : > { %v1044_v38 = vpop.permute.xlu1 %1043 }
 0x1de   : > { %v1066_v50 = vand.u32 2147483647, %v2404_v30  ;;  %v1067_v10 = vand.u32 2147483647, %v2407_v42  ;;  %v2411_v0 = vadd.f32 %v1044_v38, %v1020_v23  ;;  %v2413_v15 = vadd.f32 %v1044_v38, %v1021_v27 }
 0x1df   : > { %vm1219_vm9 = vcmp.ge.f32.partialorder %v2407_v42, 0.0 }
 0x1e0   : > { %v1074_v35 = vmul.f32 0.3275911, %v1066_v50  ;;  %v1075_v21 = vmul.f32 0.3275911, %v1067_v10  ;;  %v2416_v3 = vmul.f32 0.70710677, %v2411_v0 }
 0x1e1   : > { %v885_v5 = vpop.permute.xlu1 %884  ;;  %v2419_v57 = vmul.f32 0.70710677, %v2413_v15  ;;  %v1171_v25 = vsub.f32 0.0, %v1067_v10  ;;  %v1170_v44 = vsub.f32 0.0, %v1066_v50 }
 0x1e2   : > { %v1082_v4 = vadd.f32 1.0, %v1074_v35  ;;  %v1083_v58 = vadd.f32 1.0, %v1075_v21  ;;  %v1068_v9 = vand.u32 2147483647, %v2416_v3  ;;  %v2423_v39 = vpop.eup %1454  ;;  %vm1220_vm10 = vcmp.ge.f32.partialorder %v2416_v3, 0.0 }
 0x1e3   : > { %v1069_v18 = vand.u32 2147483647, %v2419_v57  ;;  %v2427_v31 = vpop.eup %1456  ;;  %v1094_v34 = vmul.f32 1.0614054, %v2423_v39  ;;  %v1179_v59 = vmul.f32 %v1171_v25, %v1067_v10  ;;  %v1166_v10 = vsub.f32 0.0, %v2361_v36 }
 0x1e4   : > { %1458 = vrcp.f32 %v1082_v4  ;;  %v1076_v61 = vmul.f32 0.3275911, %v1068_v9  ;;  %v1095_v46 = vmul.f32 1.0614054, %v2427_v31  ;;  %v1172_v40 = vsub.f32 0.0, %v1068_v9 }
 0x1e5   : > { %1460 = vrcp.f32 %v1083_v58  ;;  %v893_v6 = vpop.permute.xlu1 %892  ;;  %v1077_v24 = vmul.f32 0.3275911, %v1069_v18  ;;  %v1102_v7 = vadd.f32 -1.4531521, %v1094_v34  ;;  %v1173_v45 = vsub.f32 0.0, %v1069_v18 }
 0x1e6   : > { %v1084_v55 = vadd.f32 1.0, %v1076_v61  ;;  %v900_v43 = vsel %vm898_vm13, %v885_v5, %v893_v6  ;;  %v904_v51 = vsel %vm898_vm13, %v893_v6, %v885_v5  ;;  %v1103_v23 = vadd.f32 -1.4531521, %v1095_v46 }
 0x1e7   : > { %v1085_v53 = vadd.f32 1.0, %v1077_v24  ;;  %v914_v19 = vsel %vm2649_vm5, %v904_v51, 0.0  ;;  %v937_v62 = vmul.f32 %v2650_v20, %v900_v43  ;;  %v1110_v35 = vmul.f32 %v2423_v39, %v1102_v7 }
 0x1e8   : > { %1462 = vrcp.f32 %v1084_v55  ;;  %v938_v37 = vmul.f32 %v2650_v20, %v914_v19  ;;  %v1180_v21 = vmul.f32 %v1172_v40, %v1068_v9  ;;  %v1192_v6 = vmul.f32 1.442695, %v1179_v59 }
 0x1e9   : > { %v954_v8 = vpop.permute.xlu1 %953  ;;  %1464 = vrcp.f32 %v1085_v53  ;;  %v945_v11 = vadd.f32 %v937_v62, %v2228_v28  ;;  %v1178_v28 = vmul.f32 %v1170_v44, %v1066_v50  ;;  %v1181_v61 = vmul.f32 %v1173_v45, %v1069_v18 }
 0x1ea   : > { %v946_v47 = vadd.f32 %v938_v37, %v2277_v48  ;;  %v1111_v53 = vmul.f32 %v2427_v31, %v1103_v23  ;;  %v1118_v34 = vadd.f32 1.4214138, %v1110_v35  ;;  %v1194_v19 = vmul.f32 1.442695, %v1180_v21 }
 0x1eb   : > { %v1190_v51 = vmul.f32 1.442695, %v1178_v28  ;;  %1466 = vpow2.f32 %v1192_v6  ;;  %v1196_v25 = vmul.f32 1.442695, %v1181_v61  ;;  %vm1221_vm11 = vcmp.ge.f32.partialorder %v2419_v57, 0.0 }
 0x1ec   : > { %v1119_v44 = vadd.f32 1.4214138, %v1111_v53  ;;  %vm1214_vm13 = vcmp.ge.f32.partialorder %v2337_v63, 0.0 }
 0x1ed   : > { %v962_v29 = vpop.permute.xlu1 %961  ;;  %1468 = vpow2.f32 %v1190_v51 }
 0x1ee   : > { %v969_v22 = vsel %vm967_vm1, %v954_v8, %v962_v29  ;;  %v973_v60 = vsel %vm967_vm1, %v962_v29, %v954_v8  ;;  %v1167_v8 = vsub.f32 0.0, %v2376_v54  ;;  %1470 = vpow2.f32 %v1194_v19 }
 0x1ef   : > { %v984_v52 = vsel %vm1879_vm8, %v969_v22, 0.0  ;;  %v985_v1 = vsel %vm2250_vm12, %v973_v60, 0.0  ;;  %v1174_v22 = vmul.f32 %v1166_v10, %v2361_v36  ;;  %1472 = vpow2.f32 %v1196_v25 }
 0x1f0   : > { %v1008_v56 = vmul.f32 %v2651_v41, %v984_v52  ;;  %v1009_v33 = vmul.f32 %v2651_v41, %v985_v1  ;;  %v1175_v40 = vmul.f32 %v1167_v8, %v2376_v54  ;;  %v1126_v36 = vmul.f32 %v2423_v39, %v1118_v34 }
 0x1f1   : > { %v2445_v32 = vpop.eup %1458  ;;  %v1034_v5 = vpop.permute.xlu1 %1033  ;;  %v1127_v45 = vmul.f32 %v2427_v31, %v1119_v44  ;;  %vm1218_vm8 = vcmp.ge.f32.partialorder %v2404_v30, 0.0  ;;  %v1244_v30 = vmul.f32 0.5, %v2411_v0  ;;  %vm1273_vm1 = vcmask 261120  }
 0x1f2   : > { %v2451_v12 = vpop.eup %1460  ;;  %v1098_v14 = vmul.f32 1.0614054, %v2445_v32  ;;  %v1016_v27 = vadd.f32 %v1008_v56, %v945_v11  ;;  %v1017_v49 = vadd.f32 %v1009_v33, %v946_v47  ;;  %v1184_v35 = vmul.f32 1.442695, %v1175_v40 }
 0x1f3   : > { %v1099_v38 = vmul.f32 1.0614054, %v2451_v12 }
 0x1f4   : > { %v2456_v4 = vadd.f32 %v1034_v5, %v1016_v27  ;;  %v2458_v58 = vadd.f32 %v1034_v5, %v1017_v49  ;;  %v1106_v24 = vadd.f32 -1.4531521, %v1098_v14  ;;  %v1134_v5 = vadd.f32 -0.28449672, %v1126_v36 }
 0x1f5   : > { %v1107_v48 = vadd.f32 -1.4531521, %v1099_v38  ;;  %v2461_v55 = vpop.eup %1462  ;;  %v1182_v38 = vmul.f32 1.442695, %v1174_v22  ;;  %v1271_v26 = vpop.permute.xlu1 %1270 }
 0x1f6   : > { %v2466_v50 = vmul.f32 0.70710677, %v2456_v4  ;;  %v2469_v9 = vmul.f32 0.70710677, %v2458_v58  ;;  %v2471_v43 = vpop.eup %1464  ;;  %v1100_v29 = vmul.f32 1.0614054, %v2461_v55  ;;  %v1114_v46 = vmul.f32 %v2445_v32, %v1106_v24 }
 0x1f7   : > { %v1115_v18 = vmul.f32 %v2451_v12, %v1107_v48  ;;  %v1101_v37 = vmul.f32 1.0614054, %v2471_v43  ;;  %v1135_v48 = vadd.f32 -0.28449672, %v1127_v45  ;;  %v1142_v25 = vmul.f32 %v2423_v39, %v1134_v5 }
 0x1f8   : > { %v1064_v20 = vand.u32 2147483647, %v2466_v50  ;;  %v2476_v62 = vand.u32 2147483647, %v2469_v9  ;;  %v1108_v56 = vadd.f32 -1.4531521, %v1100_v29  ;;  %v1467_v29 = vpop.eup %1466 }
 0x1f9   : > { %v1109_v52 = vadd.f32 -1.4531521, %v1101_v37  ;;  %v1123_v1 = vadd.f32 1.4214138, %v1115_v18  ;;  %v1122_v59 = vadd.f32 1.4214138, %v1114_v46  ;;  %v1143_v44 = vmul.f32 %v2427_v31, %v1135_v48 }
 0x1fa   : > { %v1072_v60 = vmul.f32 0.3275911, %v1064_v20  ;;  %v1073_v7 = vmul.f32 0.3275911, %v2476_v62  ;;  %v1116_v54 = vmul.f32 %v2461_v55, %v1108_v56  ;;  %v1168_v61 = vsub.f32 0.0, %v1064_v20  ;;  %v1469_v40 = vpop.eup %1468 }
 0x1fb   : > { %v1117_v33 = vmul.f32 %v2471_v43, %v1109_v52  ;;  %v1131_v47 = vmul.f32 %v2451_v12, %v1123_v1  ;;  %v1130_v49 = vmul.f32 %v2445_v32, %v1122_v59  ;;  %v1169_v51 = vsub.f32 0.0, %v2476_v62 }
 0x1fc   : > { %v1080_v11 = vadd.f32 1.0, %v1072_v60  ;;  %v1081_v41 = vadd.f32 1.0, %v1073_v7  ;;  %v1124_v27 = vadd.f32 1.4214138, %v1116_v54  ;;  %v1176_v22 = vmul.f32 %v1168_v61, %v1064_v20 }
 0x1fd   : > { %v1125_v14 = vadd.f32 1.4214138, %v1117_v33  ;;  %v1139_v23 = vadd.f32 -0.28449672, %v1131_v47  ;;  %v1138_v6 = vadd.f32 -0.28449672, %v1130_v49 }
 0x1fe   : > { %1474 = vrcp.f32 %v1080_v11  ;;  %v1132_v10 = vmul.f32 %v2461_v55, %v1124_v27  ;;  %v1243_v52 = vmul.f32 0.5, %v2399_v17  ;;  %v1471_v11 = vpop.eup %1470  ;;  %v1150_v20 = vadd.f32 0.2548296, %v1142_v25 }
 0x1ff   : > { %1476 = vrcp.f32 %v1081_v41  ;;  %v1133_v28 = vmul.f32 %v2471_v43, %v1125_v14  ;;  %v1147_v21 = vmul.f32 %v2451_v12, %v1139_v23  ;;  %v1146_v34 = vmul.f32 %v2445_v32, %v1138_v6  ;;  %v1473_v47 = vpop.eup %1472 }
 0x200   : > { %v1140_v8 = vadd.f32 -0.28449672, %v1132_v10  ;;  %1478 = vpow2.f32 %v1182_v38  ;;  %v1177_v41 = vmul.f32 %v1169_v51, %v2476_v62  ;;  %v1151_v17 = vadd.f32 0.2548296, %v1143_v44 }
 0x201   : > { %v1141_v24 = vadd.f32 -0.28449672, %v1133_v28  ;;  %v1155_v53 = vadd.f32 0.2548296, %v1147_v21  ;;  %1480 = vpow2.f32 %v1184_v35  ;;  %v1154_v46 = vadd.f32 0.2548296, %v1146_v34 }
 0x202   : > { %v1148_v37 = vmul.f32 %v2461_v55, %v1140_v8  ;;  %v1186_v54 = vmul.f32 1.442695, %v1176_v22  ;;  %v1188_v38 = vmul.f32 1.442695, %v1177_v41  ;;  %v1159_v10 = vmul.f32 %v2427_v31, %v1151_v17 }
 0x203   : > { %v1149_v19 = vmul.f32 %v2471_v43, %v1141_v24  ;;  %v1163_v18 = vmul.f32 %v2451_v12, %v1155_v53  ;;  %v1162_v12 = vmul.f32 %v2445_v32, %v1154_v46  ;;  %v1242_v46 = vmul.f32 0.5, %v2397_v16 }
 0x204   : > { %v1156_v1 = vadd.f32 0.2548296, %v1148_v37  ;;  %1482 = vpow2.f32 %v1186_v54  ;;  %vm1216_vm15 = vcmp.ge.f32.partialorder %v2466_v50, 0.0  ;;  %vm1217_vm0 = vcmp.ge.f32.partialorder %v2469_v9, 0.0 }
 0x205   : > { %v1157_v60 = vadd.f32 0.2548296, %v1149_v19  ;;  %v1203_v7 = vmul.f32 %v1467_v29, %v1163_v18  ;;  %v1202_v36 = vmul.f32 %v1469_v40, %v1162_v12  ;;  %1484 = vpow2.f32 %v1188_v38 }
 0x206   : > { %v1164_v59 = vmul.f32 %v2461_v55, %v1156_v1  ;;  %v1158_v55 = vmul.f32 %v2423_v39, %v1150_v20  ;;  %v1245_v18 = vmul.f32 0.5, %v2413_v15  ;;  %v1240_v63 = vmul.f32 0.5, %v2456_v4 }
 0x207   : > { %v1165_v56 = vmul.f32 %v2471_v43, %v1157_v60  ;;  %v1211_v33 = vsub.f32 1.0, %v1203_v7  ;;  %v1210_v49 = vsub.f32 1.0, %v1202_v36 }
 0x208   : > { %v1204_v62 = vmul.f32 %v1471_v11, %v1164_v59 }
 0x209   : > { %v1205_v14 = vmul.f32 %v1473_v47, %v1165_v56  ;;  %v1227_v32 = vsub.f32 0.0, %v1211_v33  ;;  %v1226_v48 = vsub.f32 0.0, %v1210_v49 }
 0x20a   : > { %v1212_v5 = vsub.f32 1.0, %v1204_v62 }
 0x20b   : > { %v1475_v45 = vpop.eup %1474  ;;  %v1213_v35 = vsub.f32 1.0, %v1205_v14  ;;  %v1235_v28 = vsel %vm1219_vm9, %v1211_v33, %v1227_v32  ;;  %v1234_v34 = vsel %vm1218_vm8, %v1210_v49, %v1226_v48 }
 0x20c   : > { %v1477_v23 = vpop.eup %1476  ;;  %v1096_v27 = vmul.f32 1.0614054, %v1475_v45  ;;  %v1251_v53 = vadd.f32 1.0, %v1235_v28  ;;  %v1228_v8 = vsub.f32 0.0, %v1212_v5  ;;  %v1250_v39 = vadd.f32 1.0, %v1234_v34 }
 0x20d   : > { %v1097_v43 = vmul.f32 1.0614054, %v1477_v23  ;;  %v1229_v61 = vsub.f32 0.0, %v1213_v35  ;;  %v1479_v19 = vpop.eup %1478 }
 0x20e   : > { %v1104_v21 = vadd.f32 -1.4531521, %v1096_v27  ;;  %v1236_v25 = vsel %vm1220_vm10, %v1212_v5, %v1228_v8  ;;  %v1481_v37 = vpop.eup %1480  ;;  %v1198_v60 = vmul.f32 %v1479_v19, %v1158_v55  ;;  %v1259_v57 = vmul.f32 %v1251_v53, %v1243_v52 }
 0x20f   : > { %v1105_v6 = vadd.f32 -1.4531521, %v1097_v43  ;;  %v1237_v42 = vsel %vm1221_vm11, %v1213_v35, %v1229_v61  ;;  %v1252_v22 = vadd.f32 1.0, %v1236_v25  ;;  %v1199_v1 = vmul.f32 %v1481_v37, %v1159_v10 }
 0x210   : > { %v1112_v24 = vmul.f32 %v1475_v45, %v1104_v21  ;;  %v1253_v31 = vadd.f32 1.0, %v1237_v42  ;;  %v1258_v11 = vmul.f32 %v1250_v39, %v1242_v46  ;;  %v1206_v47 = vsub.f32 1.0, %v1198_v60 }
 0x211   : > { %v1113_v51 = vmul.f32 %v1477_v23, %v1105_v6  ;;  %v1260_v15 = vmul.f32 %v1252_v22, %v1244_v30  ;;  %v1207_v16 = vsub.f32 1.0, %v1199_v1  ;;  %v1483_v17 = vpop.eup %1482  ;;  %v1241_v61 = vmul.f32 0.5, %v2458_v58 }
 0x212   : > { %v1120_v29 = vadd.f32 1.4214138, %v1112_v24  ;;  %v1261_v40 = vmul.f32 %v1253_v31, %v1245_v18  ;;  %v1222_v54 = vsub.f32 0.0, %v1206_v47  ;;  %v1485_v27 = vpop.eup %1484 }
 0x213   : > { %v1121_v44 = vadd.f32 1.4214138, %v1113_v51  ;;  %v1265_v3 = vpack.c.bf16 %v1260_v15, %v1258_v11  ;;  %v1223_v14 = vsub.f32 0.0, %v1207_v16 }
 0x214   : > { %v1128_v7 = vmul.f32 %v1475_v45, %v1120_v29  ;;  %v1266_v56 = vpack.c.bf16 %v1261_v40, %v1259_v57  ;;  %v1230_v43 = vsel %vm1214_vm13, %v1206_v47, %v1222_v54 }
 0x215   : > { %v1129_v12 = vmul.f32 %v1477_v23, %v1121_v44  ;;  %v1231_v35 = vsel %vm1215_vm14, %v1207_v16, %v1223_v14  ;;  %v1246_v21 = vadd.f32 1.0, %v1230_v43 }
 0x216   : > { %v1136_v41 = vadd.f32 -0.28449672, %v1128_v7  ;;  %1289 = vmatprep.subr.bf16.mxu1 %v1266_v56  ;;  %v1247_v48 = vadd.f32 1.0, %v1231_v35 }
 0x217   : > { %v1137_v33 = vadd.f32 -0.28449672, %v1129_v12  ;;  %1290 = vmatpush1.bf16.msra.mxu1 %v1265_v3 }
 0x218   : > { %v1144_v20 = vmul.f32 %v1475_v45, %v1136_v41  ;;  %v1255_v50 = vmul.f32 %v1247_v48, %v1239_v2 }
 0x219   : > { %v1145_v59 = vmul.f32 %v1477_v23, %v1137_v33 }
 0x21a   : > { %v1152_v0 = vadd.f32 0.2548296, %v1144_v20 }
 0x21b   : > { %v1153_v36 = vadd.f32 0.2548296, %v1145_v59 }
 0x21c   : > { %v1160_v52 = vmul.f32 %v1475_v45, %v1152_v0 }
 0x21d   : > { %v1161_v32 = vmul.f32 %v1477_v23, %v1153_v36  ;;  %v1238_v23 = vmul.f32 0.5, %v2309_v13  ;;  %v1262_v13 = vld [vmem:[%s2545_s5] sm:$0x3] }
 0x21e   : > { %v1200_v62 = vmul.f32 %v1483_v17, %v1160_v52 }
 0x21f   : > { %v1201_v49 = vmul.f32 %v1485_v27, %v1161_v32  ;;  %v1254_v53 = vmul.f32 %v1246_v21, %v1238_v23 }
 0x220   : > { %v1208_v38 = vsub.f32 1.0, %v1200_v62 }
 0x221   : > { %v1209_v28 = vsub.f32 1.0, %v1201_v49 }
 0x222   : > { %v1224_v55 = vsub.f32 0.0, %v1208_v38 }
 0x223   : > { %v1225_v5 = vsub.f32 0.0, %v1209_v28 }
 0x224   : > { %v1232_v45 = vsel %vm1216_vm15, %v1208_v38, %v1224_v55 }
 0x225   : > { %v1233_v10 = vsel %vm1217_vm0, %v1209_v28, %v1225_v5  ;;  %v1248_v6 = vadd.f32 1.0, %v1232_v45 }
 0x226   : > { %v1249_v24 = vadd.f32 1.0, %v1233_v10 }
 0x227   : > { %v1256_v8 = vmul.f32 %v1248_v6, %v1240_v63 }
 0x228   : > { %v1257_v34 = vmul.f32 %v1249_v24, %v1241_v61 }
 0x229   : > { %v1263_v51 = vpack.c.bf16 %v1256_v8, %v1254_v53 }
 0x22a   : > { %v1264_v42 = vpack.c.bf16 %v1257_v34, %v1255_v50 }
 0x22c   : > { %1291 = vmatprep.subr.bf16.mxu1 %v1264_v42 }
 0x22d   : > { %1292 = vmatpush1.bf16.msra.mxu1 %v1263_v51 }
 0x230   : > { %1393 = vmatmul.mubr.msk.bf16.vlgmr.msra.gmra.mxu1 %vm1273_vm1, %v1262_v13 }
 0x2f0   : > { %v1311_v4 = vpop.f32.mrf.mxu1 }
 0x2f1   : > { %v1312_v58 = vadd.f32 %v1311_v4, %v1271_v26 }
 0x2f2   : > { %v1313_v9 = vpop.f32.mrf.mxu1 }
 0x2f3   : > { %v1314_v39 = vadd.f32 %v1313_v9, %v1271_v26 }
 0x2f4   : > { %v1315_v19 = vpop.f32.mrf.mxu1 }
 0x2f5   : > { %v1320_v18 = vcombine.low %v1312_v58, %v1314_v39 }
 0x2f6   : > { %v1316_v29 = vpop.f32.mrf.mxu1 }
 0x2f7   : > { %1322 = vst [vmem:[%s278_s8] sm:$0xff] %v1320_v18 }
 0x2f8 PF: > { %s17_s24 = sadd.s32 1, %s1492_s24  }
 0x2f9   : > { %p14_p4 = scmp.ge.s32.totalorder %s17_s24, 4  }
 0x2fb   :  { %16 = sbr.rel (!%p14_p4) target bundleno = 1 (0x1), region = 78 }

</bundles_post_ra>
